<compile_context>
chip_gen: v7x
topology: tpu7x:2x2x1
jax: 0.10.0
libtpu: 0.0.40
codegen_flags: <defaults>
</compile_context>

<pallas_src>
import numpy as np
import jax
import jax.numpy as jnp
from jax.experimental import pallas as pl
from jax.experimental.pallas import tpu as pltpu

# ----------------------------- config -------------------------------------
INPUT_DIM = 4
HIDDEN_DIM = 32
N_LAYERS = 2          # kernel is specialized for the 2-layer variant
BATCH = 2
SEQ = 8

# Weight-slab row offsets.  All section starts are 8-row (sublane-tile) aligned;
# the slab is (128, 4H=128) f32 -> exactly 16 vregs / 64 KiB.
_R_WIH0 = 0     # rows 0:4     Wih0^T   (INPUT_DIM, 4H), gate cols [i,f,o,g]
_R_WHH0 = 8     # rows 8:40    Whh0^T   (H, 4H)
_R_B0   = 40    # row  40      b_ih0 + b_hh0                (1, 4H)
_R_W1   = 48    # rows 48:112  [Wih1^T ; Whh1^T]            (2H, 4H)
_R_B1   = 112   # row  112     b_ih1 + b_hh1                (1, 4H)
_R_FC   = 120   # row  120     lanes 0:H = w_fc, lane H = b_fc
_SLAB_ROWS = 128

_VMEM = pl.BlockSpec(memory_space=pltpu.MemorySpace.VMEM)


# --------------------------- fused Pallas kernel ----------------------------
def fused_lstm_fc_kernel(x_ref, slab_ref, hc0_ref, out_ref):
    """Fused 2-layer LSTM recurrence + Linear(H, 1) head.

    x_ref    : (B*S, D)   batch-major flattened input
    slab_ref : (128, 4H)  packed weights (see _R_* offsets)
    hc0_ref  : (2L, B, H) [h0_l0, h0_l1, c0_l0, c0_l1]
    out_ref  : (B, S)
    """
    H = HIDDEN_DIM
    L = N_LAYERS
    BS, D = x_ref.shape
    B = hc0_ref.shape[1]
    S = BS // B

    # ---- unpack the weight slab with static, tile-aligned ref slices -------
    wih0 = slab_ref[_R_WIH0:_R_WIH0 + D, :]          # (D, 4H)
    whh0 = slab_ref[_R_WHH0:_R_WHH0 + H, :]          # (H, 4H)
    b0 = slab_ref[_R_B0:_R_B0 + 1, :]                # (1, 4H)
    w1 = slab_ref[_R_W1:_R_W1 + 2 * H, :]            # (2H, 4H) = [Wih1; Whh1]
    b1 = slab_ref[_R_B1:_R_B1 + 1, :]                # (1, 4H)
    fc_row = slab_ref[_R_FC:_R_FC + 1, :]            # (1, 4H)
    wfc = fc_row[:, 0:H]                             # (1, H)
    bfc = fc_row[:, H:H + 1]                         # (1, 1)

    # ---- hoisted layer-0 input projection: one MXU matmul over all steps ---
    xw0 = jnp.dot(x_ref[...], wih0,
                  preferred_element_type=jnp.float32) + b0      # (B*S, 4H)
    xw0 = xw0.reshape(B, S, 4 * H)                               # (B, S, 4H)

    h = [hc0_ref[l] for l in range(L)]        # each (B, H)
    c = [hc0_ref[L + l] for l in range(L)]

    def cell(gates, c_prev):
        # gate columns are [i, f, o, g]: one contiguous sigmoid slice (3H)
        # and one tanh slice (H).
        sig = jax.nn.sigmoid(gates[:, :3 * H])
        g_gate = jnp.tanh(gates[:, 3 * H:])
        i_gate = sig[:, 0 * H:1 * H]
        f_gate = sig[:, 1 * H:2 * H]
        o_gate = sig[:, 2 * H:3 * H]
        c_new = f_gate * c_prev + i_gate * g_gate
        h_new = o_gate * jnp.tanh(c_new)
        return h_new, c_new

    h1_steps = []
    for t in range(S):          # static unroll; S is a compile-time constant
        # layer 0: precomputed input projection + hidden matmul
        gates0 = xw0[:, t, :] + jnp.dot(h[0], whh0,
                                        preferred_element_type=jnp.float32)
        h[0], c[0] = cell(gates0, c[0])
        # layer 1: single fused (input+hidden) matmul  (B,2H) @ (2H,4H)
        inp1 = jnp.concatenate([h[0], h[1]], axis=-1)            # (B, 2H)
        gates1 = jnp.dot(inp1, w1,
                         preferred_element_type=jnp.float32) + b1
        h[1], c[1] = cell(gates1, c[1])
        h1_steps.append(h[1])

    # ---- FC head hoisted out of the loop: one reduction + one store --------
    h_all = jnp.stack(h1_steps, axis=1)                          # (B, S, H)
    out_ref[...] = jnp.sum(h_all * wfc.reshape(1, 1, H), axis=-1) + bfc


# ------------------------------ wrapper -------------------------------------
def lstm_net_forward(x, weight_slab, hc0):
    """Forward pass of LSTMNetBasic (n_layers=2) as a single fused pallas_call.

    x           : (B, S, INPUT_DIM)  batch-first, as in PyTorch
    weight_slab : (128, 4H)          packed weights (pack_kernel_params)
    hc0         : (2*L, B, H)        [h0 ; c0]
    returns     : (B, S)             out.squeeze() of the PyTorch module
    """
    B, S, D = x.shape
    x2d = x.reshape(B * S, D)        # pure metadata reshape in the wrapper
    return pl.pallas_call(
        fused_lstm_fc_kernel,
        out_shape=jax.ShapeDtypeStruct((B, S), jnp.float32),
        in_specs=[_VMEM, _VMEM, _VMEM],
        out_specs=_VMEM,
    )(x2d, weight_slab, hc0)


# ------------------------- parameter packing --------------------------------
def _repack_gate_cols(w):
    """Permute the 4H gate columns from PyTorch's [i, f, g, o] to [i, f, o, g]."""
    H = HIDDEN_DIM
    return jnp.concatenate(
        [w[..., 0:2 * H], w[..., 3 * H:4 * H], w[..., 2 * H:3 * H]], axis=-1)


def pack_kernel_params(layer_params, w_fc, b_fc):
    """One-time repack of canonical (PyTorch-layout) params into one slab."""
    H = HIDDEN_DIM
    assert len(layer_params) == N_LAYERS == 2
    (wih0, whh0, b0), (wih1, whh1, b1) = [
        tuple(_repack_gate_cols(p) for p in lp) for lp in layer_params]

    slab = jnp.zeros((_SLAB_ROWS, 4 * H), jnp.float32)
    slab = slab.at[_R_WIH0:_R_WIH0 + INPUT_DIM].set(wih0)        # (D, 4H)
    slab = slab.at[_R_WHH0:_R_WHH0 + H].set(whh0)                # (H, 4H)
    slab = slab.at[_R_B0:_R_B0 + 1].set(b0)                      # (1, 4H)
    slab = slab.at[_R_W1:_R_W1 + H].set(wih1)                    # Wih1  (H, 4H)
    slab = slab.at[_R_W1 + H:_R_W1 + 2 * H].set(whh1)            # Whh1  (H, 4H)
    slab = slab.at[_R_B1:_R_B1 + 1].set(b1)                      # (1, 4H)
    fc_row = jnp.zeros((4 * H,), jnp.float32)
    fc_row = fc_row.at[:H].set(w_fc[0]).at[H].set(b_fc[0])
    slab = slab.at[_R_FC].set(fc_row)
    return slab


# --------------------------- pure-JAX reference -----------------------------
def lstm_net_reference(x, layer_params, h0, c0, w_fc, b_fc):
    """Reference using the canonical PyTorch gate order [i, f, g, o]."""
    B, S, _ = x.shape
    H = HIDDEN_DIM
    inp = x
    for layer_idx, (wih_t, whh_t, bias) in enumerate(layer_params):
        h = h0[layer_idx]
        c = c0[layer_idx]
        hs = []
        for t in range(S):
            gates = inp[:, t, :] @ wih_t + h @ whh_t + bias
            i = jax.nn.sigmoid(gates[:, 0 * H:1 * H])
            f = jax.nn.sigmoid(gates[:, 1 * H:2 * H])
            g = jnp.tanh(gates[:, 2 * H:3 * H])
            o = jax.nn.sigmoid(gates[:, 3 * H:4 * H])
            c = f * c + i * g
            h = o * jnp.tanh(c)
            hs.append(h)
        inp = jnp.stack(hs, axis=1)       # (B, S, H)
    out = inp @ w_fc.T + b_fc             # (B, S, 1)
    return out[..., 0]                    # (B, S)


# ------------------------------ param init ----------------------------------
def init_params(key):
    """Deterministic init mirroring PyTorch's U(-1/sqrt(H), 1/sqrt(H))."""
    std = 1.0 / np.sqrt(HIDDEN_DIM)
    layer_params = []
    for layer in range(N_LAYERS):
        d_in = INPUT_DIM if layer == 0 else HIDDEN_DIM
        key, k1, k2, k3, k4 = jax.random.split(key, 5)
        w_ih = jax.random.uniform(k1, (4 * HIDDEN_DIM, d_in), jnp.float32, -std, std)
        w_hh = jax.random.uniform(k2, (4 * HIDDEN_DIM, HIDDEN_DIM), jnp.float32, -std, std)
        b_ih = jax.random.uniform(k3, (4 * HIDDEN_DIM,), jnp.float32, -std, std)
        b_hh = jax.random.uniform(k4, (4 * HIDDEN_DIM,), jnp.float32, -std, std)
        # (D_in, 4H), (H, 4H), (1, 4H) with PyTorch gate order [i, f, g, o]
        layer_params.append((w_ih.T, w_hh.T, (b_ih + b_hh)[None, :]))

    key, k5, k6 = jax.random.split(key, 3)
    w_fc = jax.random.uniform(k5, (1, HIDDEN_DIM), jnp.float32, -std, std)  # (1, H)
    b_fc = jax.random.uniform(k6, (1,), jnp.float32, -std, std)             # (1,)

    # h0 / c0 are randn-initialized inside forward() in the PyTorch module;
    # generated here as one (2L, B, H) array so the kernel gets a single DMA.
    key, k7 = jax.random.split(key)
    hc0 = jax.random.normal(k7, (2 * N_LAYERS, BATCH, HIDDEN_DIM), jnp.float32)

    return layer_params, w_fc, b_fc, hc0, key


# ------------------------------- main ---------------------------------------
if __name__ == "__main__":
    key = jax.random.PRNGKey(0)
    layer_params, w_fc, b_fc, hc0, key = init_params(key)
    h0, c0 = hc0[:N_LAYERS], hc0[N_LAYERS:]

    key, kx = jax.random.split(key)
    x = jax.random.normal(kx, (BATCH, SEQ, INPUT_DIM), jnp.float32)

    weight_slab = pack_kernel_params(layer_params, w_fc, b_fc)   # one-time repack

    forward = jax.jit(lstm_net_forward)
    out = forward(x, weight_slab, hc0)
    out = jax.block_until_ready(out)

    ref = lstm_net_reference(x, layer_params, h0, c0, w_fc, b_fc)
    ref = jax.block_until_ready(ref)

    assert out.shape == (BATCH, SEQ), f"bad output shape: {out.shape}"
    np.testing.assert_allclose(np.asarray(out), np.asarray(ref), atol=1e-5, rtol=1e-5)

    print("KERNEL_OK")
</pallas_src>

<mosaic_0001>
module attributes {stable_mosaic.version = 11 : i64} {
  func.func @fused_lstm_fc_kernel(%arg0: memref<16x4xf32, #tpu.memory_space<vmem>>, %arg1: memref<128x128xf32, #tpu.memory_space<vmem>>, %arg2: memref<4x2x32xf32, #tpu.memory_space<vmem>>, %arg3: memref<2x8xf32, #tpu.memory_space<vmem>>) attributes {dimension_semantics = [], scalar_prefetch = 0 : i64, scratch_operands = 0 : i64, tpu.core_type = #tpu.core_type<tc>} {
    %c0 = arith.constant 0 : index
    %c0_0 = arith.constant 0 : index
    %0 = vector.load %arg1[%c0, %c0_0] : memref<128x128xf32, #tpu.memory_space<vmem>>, vector<4x128xf32>
    %c8 = arith.constant 8 : index
    %c0_1 = arith.constant 0 : index
    %1 = vector.load %arg1[%c8, %c0_1] : memref<128x128xf32, #tpu.memory_space<vmem>>, vector<32x128xf32>
    %c40 = arith.constant 40 : index
    %c0_2 = arith.constant 0 : index
    %2 = vector.load %arg1[%c40, %c0_2] : memref<128x128xf32, #tpu.memory_space<vmem>>, vector<1x128xf32>
    %c48 = arith.constant 48 : index
    %c0_3 = arith.constant 0 : index
    %3 = vector.load %arg1[%c48, %c0_3] : memref<128x128xf32, #tpu.memory_space<vmem>>, vector<64x128xf32>
    %c112 = arith.constant 112 : index
    %c0_4 = arith.constant 0 : index
    %4 = vector.load %arg1[%c112, %c0_4] : memref<128x128xf32, #tpu.memory_space<vmem>>, vector<1x128xf32>
    %c120 = arith.constant 120 : index
    %c0_5 = arith.constant 0 : index
    %5 = vector.load %arg1[%c120, %c0_5] : memref<128x128xf32, #tpu.memory_space<vmem>>, vector<1x128xf32>
    %6 = vector.extract_strided_slice %5 {offsets = [0, 0], sizes = [1, 32], strides = [1, 1]} : vector<1x128xf32> to vector<1x32xf32>
    %7 = vector.extract_strided_slice %5 {offsets = [0, 32], sizes = [1, 1], strides = [1, 1]} : vector<1x128xf32> to vector<1x1xf32>
    %c0_6 = arith.constant 0 : index
    %c0_7 = arith.constant 0 : index
    %8 = vector.load %arg0[%c0_6, %c0_7] : memref<16x4xf32, #tpu.memory_space<vmem>>, vector<16x4xf32>
    %cst = arith.constant dense<0.000000e+00> : vector<16x128xf32>
    %9 = tpu.matmul %8, %0, %cst {dimension_numbers = #tpu.dot_dimension_numbers<[1], [0], [0], [1], [0, 0, 1, 1], [], []>} : vector<16x4xf32>, vector<4x128xf32>, vector<16x128xf32> -> vector<16x128xf32>
    %10 = vector.broadcast %2 : vector<1x128xf32> to vector<16x128xf32>
    %11 = arith.addf %9, %10 : vector<16x128xf32>
    %12 = vector.shape_cast %11 : vector<16x128xf32> to vector<2x8x128xf32>
    %c0_8 = arith.constant 0 : index
    %c0_9 = arith.constant 0 : index
    %c0_10 = arith.constant 0 : index
    %13 = vector.load %arg2[%c0_8, %c0_9, %c0_10] : memref<4x2x32xf32, #tpu.memory_space<vmem>>, vector<1x2x32xf32>
    %14 = vector.shape_cast %13 : vector<1x2x32xf32> to vector<2x32xf32>
    %c1 = arith.constant 1 : index
    %c0_11 = arith.constant 0 : index
    %c0_12 = arith.constant 0 : index
    %15 = vector.load %arg2[%c1, %c0_11, %c0_12] : memref<4x2x32xf32, #tpu.memory_space<vmem>>, vector<1x2x32xf32>
    %16 = vector.shape_cast %15 : vector<1x2x32xf32> to vector<2x32xf32>
    %c2 = arith.constant 2 : index
    %c0_13 = arith.constant 0 : index
    %c0_14 = arith.constant 0 : index
    %17 = vector.load %arg2[%c2, %c0_13, %c0_14] : memref<4x2x32xf32, #tpu.memory_space<vmem>>, vector<1x2x32xf32>
    %18 = vector.shape_cast %17 : vector<1x2x32xf32> to vector<2x32xf32>
    %c3 = arith.constant 3 : index
    %c0_15 = arith.constant 0 : index
    %c0_16 = arith.constant 0 : index
    %19 = vector.load %arg2[%c3, %c0_15, %c0_16] : memref<4x2x32xf32, #tpu.memory_space<vmem>>, vector<1x2x32xf32>
    %20 = vector.shape_cast %19 : vector<1x2x32xf32> to vector<2x32xf32>
    %21 = vector.extract_strided_slice %12 {offsets = [0, 0, 0], sizes = [2, 1, 128], strides = [1, 1, 1]} : vector<2x8x128xf32> to vector<2x1x128xf32>
    %22 = vector.shape_cast %21 : vector<2x1x128xf32> to vector<2x128xf32>
    %cst_17 = arith.constant dense<0.000000e+00> : vector<2x128xf32>
    %23 = tpu.matmul %14, %1, %cst_17 {dimension_numbers = #tpu.dot_dimension_numbers<[1], [0], [0], [1], [0, 0, 1, 1], [], []>} : vector<2x32xf32>, vector<32x128xf32>, vector<2x128xf32> -> vector<2x128xf32>
    %24 = arith.addf %22, %23 : vector<2x128xf32>
    %25 = vector.extract_strided_slice %24 {offsets = [0, 0], sizes = [2, 96], strides = [1, 1]} : vector<2x128xf32> to vector<2x96xf32>
    %26 = arith.negf %25 : vector<2x96xf32>
    %27 = math.exp %26 : vector<2x96xf32>
    %cst_18 = arith.constant 1.000000e+00 : f32
    %28 = vector.broadcast %cst_18 : f32 to vector<2x96xf32>
    %29 = arith.addf %28, %27 : vector<2x96xf32>
    %30 = arith.divf %28, %29 : vector<2x96xf32>
    %31 = vector.extract_strided_slice %24 {offsets = [0, 96], sizes = [2, 32], strides = [1, 1]} : vector<2x128xf32> to vector<2x32xf32>
    %32 = math.tanh %31 : vector<2x32xf32>
    %33 = vector.extract_strided_slice %30 {offsets = [0, 0], sizes = [2, 32], strides = [1, 1]} : vector<2x96xf32> to vector<2x32xf32>
    %34 = vector.extract_strided_slice %30 {offsets = [0, 32], sizes = [2, 32], strides = [1, 1]} : vector<2x96xf32> to vector<2x32xf32>
    %35 = vector.extract_strided_slice %30 {offsets = [0, 64], sizes = [2, 32], strides = [1, 1]} : vector<2x96xf32> to vector<2x32xf32>
    %36 = arith.mulf %34, %18 : vector<2x32xf32>
    %37 = arith.mulf %33, %32 : vector<2x32xf32>
    %38 = arith.addf %36, %37 : vector<2x32xf32>
    %39 = math.tanh %38 : vector<2x32xf32>
    %40 = arith.mulf %35, %39 : vector<2x32xf32>
    %41 = tpu.concatenate %40, %16 in 1 : vector<2x32xf32>, vector<2x32xf32> -> vector<2x64xf32>
    %cst_19 = arith.constant dense<0.000000e+00> : vector<2x128xf32>
    %42 = tpu.matmul %41, %3, %cst_19 {dimension_numbers = #tpu.dot_dimension_numbers<[1], [0], [0], [1], [0, 0, 1, 1], [], []>} : vector<2x64xf32>, vector<64x128xf32>, vector<2x128xf32> -> vector<2x128xf32>
    %43 = vector.broadcast %4 : vector<1x128xf32> to vector<2x128xf32>
    %44 = arith.addf %42, %43 : vector<2x128xf32>
    %45 = vector.extract_strided_slice %44 {offsets = [0, 0], sizes = [2, 96], strides = [1, 1]} : vector<2x128xf32> to vector<2x96xf32>
    %46 = arith.negf %45 : vector<2x96xf32>
    %47 = math.exp %46 : vector<2x96xf32>
    %cst_20 = arith.constant 1.000000e+00 : f32
    %48 = vector.broadcast %cst_20 : f32 to vector<2x96xf32>
    %49 = arith.addf %48, %47 : vector<2x96xf32>
    %50 = arith.divf %48, %49 : vector<2x96xf32>
    %51 = vector.extract_strided_slice %44 {offsets = [0, 96], sizes = [2, 32], strides = [1, 1]} : vector<2x128xf32> to vector<2x32xf32>
    %52 = math.tanh %51 : vector<2x32xf32>
    %53 = vector.extract_strided_slice %50 {offsets = [0, 0], sizes = [2, 32], strides = [1, 1]} : vector<2x96xf32> to vector<2x32xf32>
    %54 = vector.extract_strided_slice %50 {offsets = [0, 32], sizes = [2, 32], strides = [1, 1]} : vector<2x96xf32> to vector<2x32xf32>
    %55 = vector.extract_strided_slice %50 {offsets = [0, 64], sizes = [2, 32], strides = [1, 1]} : vector<2x96xf32> to vector<2x32xf32>
    %56 = arith.mulf %54, %20 : vector<2x32xf32>
    %57 = arith.mulf %53, %52 : vector<2x32xf32>
    %58 = arith.addf %56, %57 : vector<2x32xf32>
    %59 = math.tanh %58 : vector<2x32xf32>
    %60 = arith.mulf %55, %59 : vector<2x32xf32>
    %61 = vector.extract_strided_slice %12 {offsets = [0, 1, 0], sizes = [2, 1, 128], strides = [1, 1, 1]} : vector<2x8x128xf32> to vector<2x1x128xf32>
    %62 = vector.shape_cast %61 : vector<2x1x128xf32> to vector<2x128xf32>
    %cst_21 = arith.constant dense<0.000000e+00> : vector<2x128xf32>
    %63 = tpu.matmul %40, %1, %cst_21 {dimension_numbers = #tpu.dot_dimension_numbers<[1], [0], [0], [1], [0, 0, 1, 1], [], []>} : vector<2x32xf32>, vector<32x128xf32>, vector<2x128xf32> -> vector<2x128xf32>
    %64 = arith.addf %62, %63 : vector<2x128xf32>
    %65 = vector.extract_strided_slice %64 {offsets = [0, 0], sizes = [2, 96], strides = [1, 1]} : vector<2x128xf32> to vector<2x96xf32>
    %66 = arith.negf %65 : vector<2x96xf32>
    %67 = math.exp %66 : vector<2x96xf32>
    %cst_22 = arith.constant 1.000000e+00 : f32
    %68 = vector.broadcast %cst_22 : f32 to vector<2x96xf32>
    %69 = arith.addf %68, %67 : vector<2x96xf32>
    %70 = arith.divf %68, %69 : vector<2x96xf32>
    %71 = vector.extract_strided_slice %64 {offsets = [0, 96], sizes = [2, 32], strides = [1, 1]} : vector<2x128xf32> to vector<2x32xf32>
    %72 = math.tanh %71 : vector<2x32xf32>
    %73 = vector.extract_strided_slice %70 {offsets = [0, 0], sizes = [2, 32], strides = [1, 1]} : vector<2x96xf32> to vector<2x32xf32>
    %74 = vector.extract_strided_slice %70 {offsets = [0, 32], sizes = [2, 32], strides = [1, 1]} : vector<2x96xf32> to vector<2x32xf32>
    %75 = vector.extract_strided_slice %70 {offsets = [0, 64], sizes = [2, 32], strides = [1, 1]} : vector<2x96xf32> to vector<2x32xf32>
    %76 = arith.mulf %74, %38 : vector<2x32xf32>
    %77 = arith.mulf %73, %72 : vector<2x32xf32>
    %78 = arith.addf %76, %77 : vector<2x32xf32>
    %79 = math.tanh %78 : vector<2x32xf32>
    %80 = arith.mulf %75, %79 : vector<2x32xf32>
    %81 = tpu.concatenate %80, %60 in 1 : vector<2x32xf32>, vector<2x32xf32> -> vector<2x64xf32>
    %cst_23 = arith.constant dense<0.000000e+00> : vector<2x128xf32>
    %82 = tpu.matmul %81, %3, %cst_23 {dimension_numbers = #tpu.dot_dimension_numbers<[1], [0], [0], [1], [0, 0, 1, 1], [], []>} : vector<2x64xf32>, vector<64x128xf32>, vector<2x128xf32> -> vector<2x128xf32>
    %83 = vector.broadcast %4 : vector<1x128xf32> to vector<2x128xf32>
    %84 = arith.addf %82, %83 : vector<2x128xf32>
    %85 = vector.extract_strided_slice %84 {offsets = [0, 0], sizes = [2, 96], strides = [1, 1]} : vector<2x128xf32> to vector<2x96xf32>
    %86 = arith.negf %85 : vector<2x96xf32>
    %87 = math.exp %86 : vector<2x96xf32>
    %cst_24 = arith.constant 1.000000e+00 : f32
    %88 = vector.broadcast %cst_24 : f32 to vector<2x96xf32>
    %89 = arith.addf %88, %87 : vector<2x96xf32>
    %90 = arith.divf %88, %89 : vector<2x96xf32>
    %91 = vector.extract_strided_slice %84 {offsets = [0, 96], sizes = [2, 32], strides = [1, 1]} : vector<2x128xf32> to vector<2x32xf32>
    %92 = math.tanh %91 : vector<2x32xf32>
    %93 = vector.extract_strided_slice %90 {offsets = [0, 0], sizes = [2, 32], strides = [1, 1]} : vector<2x96xf32> to vector<2x32xf32>
    %94 = vector.extract_strided_slice %90 {offsets = [0, 32], sizes = [2, 32], strides = [1, 1]} : vector<2x96xf32> to vector<2x32xf32>
    %95 = vector.extract_strided_slice %90 {offsets = [0, 64], sizes = [2, 32], strides = [1, 1]} : vector<2x96xf32> to vector<2x32xf32>
    %96 = arith.mulf %94, %58 : vector<2x32xf32>
    %97 = arith.mulf %93, %92 : vector<2x32xf32>
    %98 = arith.addf %96, %97 : vector<2x32xf32>
    %99 = math.tanh %98 : vector<2x32xf32>
    %100 = arith.mulf %95, %99 : vector<2x32xf32>
    %101 = vector.extract_strided_slice %12 {offsets = [0, 2, 0], sizes = [2, 1, 128], strides = [1, 1, 1]} : vector<2x8x128xf32> to vector<2x1x128xf32>
    %102 = vector.shape_cast %101 : vector<2x1x128xf32> to vector<2x128xf32>
    %cst_25 = arith.constant dense<0.000000e+00> : vector<2x128xf32>
    %103 = tpu.matmul %80, %1, %cst_25 {dimension_numbers = #tpu.dot_dimension_numbers<[1], [0], [0], [1], [0, 0, 1, 1], [], []>} : vector<2x32xf32>, vector<32x128xf32>, vector<2x128xf32> -> vector<2x128xf32>
    %104 = arith.addf %102, %103 : vector<2x128xf32>
    %105 = vector.extract_strided_slice %104 {offsets = [0, 0], sizes = [2, 96], strides = [1, 1]} : vector<2x128xf32> to vector<2x96xf32>
    %106 = arith.negf %105 : vector<2x96xf32>
    %107 = math.exp %106 : vector<2x96xf32>
    %cst_26 = arith.constant 1.000000e+00 : f32
    %108 = vector.broadcast %cst_26 : f32 to vector<2x96xf32>
    %109 = arith.addf %108, %107 : vector<2x96xf32>
    %110 = arith.divf %108, %109 : vector<2x96xf32>
    %111 = vector.extract_strided_slice %104 {offsets = [0, 96], sizes = [2, 32], strides = [1, 1]} : vector<2x128xf32> to vector<2x32xf32>
    %112 = math.tanh %111 : vector<2x32xf32>
    %113 = vector.extract_strided_slice %110 {offsets = [0, 0], sizes = [2, 32], strides = [1, 1]} : vector<2x96xf32> to vector<2x32xf32>
    %114 = vector.extract_strided_slice %110 {offsets = [0, 32], sizes = [2, 32], strides = [1, 1]} : vector<2x96xf32> to vector<2x32xf32>
    %115 = vector.extract_strided_slice %110 {offsets = [0, 64], sizes = [2, 32], strides = [1, 1]} : vector<2x96xf32> to vector<2x32xf32>
    %116 = arith.mulf %114, %78 : vector<2x32xf32>
    %117 = arith.mulf %113, %112 : vector<2x32xf32>
    %118 = arith.addf %116, %117 : vector<2x32xf32>
    %119 = math.tanh %118 : vector<2x32xf32>
    %120 = arith.mulf %115, %119 : vector<2x32xf32>
    %121 = tpu.concatenate %120, %100 in 1 : vector<2x32xf32>, vector<2x32xf32> -> vector<2x64xf32>
    %cst_27 = arith.constant dense<0.000000e+00> : vector<2x128xf32>
    %122 = tpu.matmul %121, %3, %cst_27 {dimension_numbers = #tpu.dot_dimension_numbers<[1], [0], [0], [1], [0, 0, 1, 1], [], []>} : vector<2x64xf32>, vector<64x128xf32>, vector<2x128xf32> -> vector<2x128xf32>
    %123 = vector.broadcast %4 : vector<1x128xf32> to vector<2x128xf32>
    %124 = arith.addf %122, %123 : vector<2x128xf32>
    %125 = vector.extract_strided_slice %124 {offsets = [0, 0], sizes = [2, 96], strides = [1, 1]} : vector<2x128xf32> to vector<2x96xf32>
    %126 = arith.negf %125 : vector<2x96xf32>
    %127 = math.exp %126 : vector<2x96xf32>
    %cst_28 = arith.constant 1.000000e+00 : f32
    %128 = vector.broadcast %cst_28 : f32 to vector<2x96xf32>
    %129 = arith.addf %128, %127 : vector<2x96xf32>
    %130 = arith.divf %128, %129 : vector<2x96xf32>
    %131 = vector.extract_strided_slice %124 {offsets = [0, 96], sizes = [2, 32], strides = [1, 1]} : vector<2x128xf32> to vector<2x32xf32>
    %132 = math.tanh %131 : vector<2x32xf32>
    %133 = vector.extract_strided_slice %130 {offsets = [0, 0], sizes = [2, 32], strides = [1, 1]} : vector<2x96xf32> to vector<2x32xf32>
    %134 = vector.extract_strided_slice %130 {offsets = [0, 32], sizes = [2, 32], strides = [1, 1]} : vector<2x96xf32> to vector<2x32xf32>
    %135 = vector.extract_strided_slice %130 {offsets = [0, 64], sizes = [2, 32], strides = [1, 1]} : vector<2x96xf32> to vector<2x32xf32>
    %136 = arith.mulf %134, %98 : vector<2x32xf32>
    %137 = arith.mulf %133, %132 : vector<2x32xf32>
    %138 = arith.addf %136, %137 : vector<2x32xf32>
    %139 = math.tanh %138 : vector<2x32xf32>
    %140 = arith.mulf %135, %139 : vector<2x32xf32>
    %141 = vector.extract_strided_slice %12 {offsets = [0, 3, 0], sizes = [2, 1, 128], strides = [1, 1, 1]} : vector<2x8x128xf32> to vector<2x1x128xf32>
    %142 = vector.shape_cast %141 : vector<2x1x128xf32> to vector<2x128xf32>
    %cst_29 = arith.constant dense<0.000000e+00> : vector<2x128xf32>
    %143 = tpu.matmul %120, %1, %cst_29 {dimension_numbers = #tpu.dot_dimension_numbers<[1], [0], [0], [1], [0, 0, 1, 1], [], []>} : vector<2x32xf32>, vector<32x128xf32>, vector<2x128xf32> -> vector<2x128xf32>
    %144 = arith.addf %142, %143 : vector<2x128xf32>
    %145 = vector.extract_strided_slice %144 {offsets = [0, 0], sizes = [2, 96], strides = [1, 1]} : vector<2x128xf32> to vector<2x96xf32>
    %146 = arith.negf %145 : vector<2x96xf32>
    %147 = math.exp %146 : vector<2x96xf32>
    %cst_30 = arith.constant 1.000000e+00 : f32
    %148 = vector.broadcast %cst_30 : f32 to vector<2x96xf32>
    %149 = arith.addf %148, %147 : vector<2x96xf32>
    %150 = arith.divf %148, %149 : vector<2x96xf32>
    %151 = vector.extract_strided_slice %144 {offsets = [0, 96], sizes = [2, 32], strides = [1, 1]} : vector<2x128xf32> to vector<2x32xf32>
    %152 = math.tanh %151 : vector<2x32xf32>
    %153 = vector.extract_strided_slice %150 {offsets = [0, 0], sizes = [2, 32], strides = [1, 1]} : vector<2x96xf32> to vector<2x32xf32>
    %154 = vector.extract_strided_slice %150 {offsets = [0, 32], sizes = [2, 32], strides = [1, 1]} : vector<2x96xf32> to vector<2x32xf32>
    %155 = vector.extract_strided_slice %150 {offsets = [0, 64], sizes = [2, 32], strides = [1, 1]} : vector<2x96xf32> to vector<2x32xf32>
    %156 = arith.mulf %154, %118 : vector<2x32xf32>
    %157 = arith.mulf %153, %152 : vector<2x32xf32>
    %158 = arith.addf %156, %157 : vector<2x32xf32>
    %159 = math.tanh %158 : vector<2x32xf32>
    %160 = arith.mulf %155, %159 : vector<2x32xf32>
    %161 = tpu.concatenate %160, %140 in 1 : vector<2x32xf32>, vector<2x32xf32> -> vector<2x64xf32>
    %cst_31 = arith.constant dense<0.000000e+00> : vector<2x128xf32>
    %162 = tpu.matmul %161, %3, %cst_31 {dimension_numbers = #tpu.dot_dimension_numbers<[1], [0], [0], [1], [0, 0, 1, 1], [], []>} : vector<2x64xf32>, vector<64x128xf32>, vector<2x128xf32> -> vector<2x128xf32>
    %163 = vector.broadcast %4 : vector<1x128xf32> to vector<2x128xf32>
    %164 = arith.addf %162, %163 : vector<2x128xf32>
    %165 = vector.extract_strided_slice %164 {offsets = [0, 0], sizes = [2, 96], strides = [1, 1]} : vector<2x128xf32> to vector<2x96xf32>
    %166 = arith.negf %165 : vector<2x96xf32>
    %167 = math.exp %166 : vector<2x96xf32>
    %cst_32 = arith.constant 1.000000e+00 : f32
    %168 = vector.broadcast %cst_32 : f32 to vector<2x96xf32>
    %169 = arith.addf %168, %167 : vector<2x96xf32>
    %170 = arith.divf %168, %169 : vector<2x96xf32>
    %171 = vector.extract_strided_slice %164 {offsets = [0, 96], sizes = [2, 32], strides = [1, 1]} : vector<2x128xf32> to vector<2x32xf32>
    %172 = math.tanh %171 : vector<2x32xf32>
    %173 = vector.extract_strided_slice %170 {offsets = [0, 0], sizes = [2, 32], strides = [1, 1]} : vector<2x96xf32> to vector<2x32xf32>
    %174 = vector.extract_strided_slice %170 {offsets = [0, 32], sizes = [2, 32], strides = [1, 1]} : vector<2x96xf32> to vector<2x32xf32>
    %175 = vector.extract_strided_slice %170 {offsets = [0, 64], sizes = [2, 32], strides = [1, 1]} : vector<2x96xf32> to vector<2x32xf32>
    %176 = arith.mulf %174, %138 : vector<2x32xf32>
    %177 = arith.mulf %173, %172 : vector<2x32xf32>
    %178 = arith.addf %176, %177 : vector<2x32xf32>
    %179 = math.tanh %178 : vector<2x32xf32>
    %180 = arith.mulf %175, %179 : vector<2x32xf32>
    %181 = vector.extract_strided_slice %12 {offsets = [0, 4, 0], sizes = [2, 1, 128], strides = [1, 1, 1]} : vector<2x8x128xf32> to vector<2x1x128xf32>
    %182 = vector.shape_cast %181 : vector<2x1x128xf32> to vector<2x128xf32>
    %cst_33 = arith.constant dense<0.000000e+00> : vector<2x128xf32>
    %183 = tpu.matmul %160, %1, %cst_33 {dimension_numbers = #tpu.dot_dimension_numbers<[1], [0], [0], [1], [0, 0, 1, 1], [], []>} : vector<2x32xf32>, vector<32x128xf32>, vector<2x128xf32> -> vector<2x128xf32>
    %184 = arith.addf %182, %183 : vector<2x128xf32>
    %185 = vector.extract_strided_slice %184 {offsets = [0, 0], sizes = [2, 96], strides = [1, 1]} : vector<2x128xf32> to vector<2x96xf32>
    %186 = arith.negf %185 : vector<2x96xf32>
    %187 = math.exp %186 : vector<2x96xf32>
    %cst_34 = arith.constant 1.000000e+00 : f32
    %188 = vector.broadcast %cst_34 : f32 to vector<2x96xf32>
    %189 = arith.addf %188, %187 : vector<2x96xf32>
    %190 = arith.divf %188, %189 : vector<2x96xf32>
    %191 = vector.extract_strided_slice %184 {offsets = [0, 96], sizes = [2, 32], strides = [1, 1]} : vector<2x128xf32> to vector<2x32xf32>
    %192 = math.tanh %191 : vector<2x32xf32>
    %193 = vector.extract_strided_slice %190 {offsets = [0, 0], sizes = [2, 32], strides = [1, 1]} : vector<2x96xf32> to vector<2x32xf32>
    %194 = vector.extract_strided_slice %190 {offsets = [0, 32], sizes = [2, 32], strides = [1, 1]} : vector<2x96xf32> to vector<2x32xf32>
    %195 = vector.extract_strided_slice %190 {offsets = [0, 64], sizes = [2, 32], strides = [1, 1]} : vector<2x96xf32> to vector<2x32xf32>
    %196 = arith.mulf %194, %158 : vector<2x32xf32>
    %197 = arith.mulf %193, %192 : vector<2x32xf32>
    %198 = arith.addf %196, %197 : vector<2x32xf32>
    %199 = math.tanh %198 : vector<2x32xf32>
    %200 = arith.mulf %195, %199 : vector<2x32xf32>
    %201 = tpu.concatenate %200, %180 in 1 : vector<2x32xf32>, vector<2x32xf32> -> vector<2x64xf32>
    %cst_35 = arith.constant dense<0.000000e+00> : vector<2x128xf32>
    %202 = tpu.matmul %201, %3, %cst_35 {dimension_numbers = #tpu.dot_dimension_numbers<[1], [0], [0], [1], [0, 0, 1, 1], [], []>} : vector<2x64xf32>, vector<64x128xf32>, vector<2x128xf32> -> vector<2x128xf32>
    %203 = vector.broadcast %4 : vector<1x128xf32> to vector<2x128xf32>
    %204 = arith.addf %202, %203 : vector<2x128xf32>
    %205 = vector.extract_strided_slice %204 {offsets = [0, 0], sizes = [2, 96], strides = [1, 1]} : vector<2x128xf32> to vector<2x96xf32>
    %206 = arith.negf %205 : vector<2x96xf32>
    %207 = math.exp %206 : vector<2x96xf32>
    %cst_36 = arith.constant 1.000000e+00 : f32
    %208 = vector.broadcast %cst_36 : f32 to vector<2x96xf32>
    %209 = arith.addf %208, %207 : vector<2x96xf32>
    %210 = arith.divf %208, %209 : vector<2x96xf32>
    %211 = vector.extract_strided_slice %204 {offsets = [0, 96], sizes = [2, 32], strides = [1, 1]} : vector<2x128xf32> to vector<2x32xf32>
    %212 = math.tanh %211 : vector<2x32xf32>
    %213 = vector.extract_strided_slice %210 {offsets = [0, 0], sizes = [2, 32], strides = [1, 1]} : vector<2x96xf32> to vector<2x32xf32>
    %214 = vector.extract_strided_slice %210 {offsets = [0, 32], sizes = [2, 32], strides = [1, 1]} : vector<2x96xf32> to vector<2x32xf32>
    %215 = vector.extract_strided_slice %210 {offsets = [0, 64], sizes = [2, 32], strides = [1, 1]} : vector<2x96xf32> to vector<2x32xf32>
    %216 = arith.mulf %214, %178 : vector<2x32xf32>
    %217 = arith.mulf %213, %212 : vector<2x32xf32>
    %218 = arith.addf %216, %217 : vector<2x32xf32>
    %219 = math.tanh %218 : vector<2x32xf32>
    %220 = arith.mulf %215, %219 : vector<2x32xf32>
    %221 = vector.extract_strided_slice %12 {offsets = [0, 5, 0], sizes = [2, 1, 128], strides = [1, 1, 1]} : vector<2x8x128xf32> to vector<2x1x128xf32>
    %222 = vector.shape_cast %221 : vector<2x1x128xf32> to vector<2x128xf32>
    %cst_37 = arith.constant dense<0.000000e+00> : vector<2x128xf32>
    %223 = tpu.matmul %200, %1, %cst_37 {dimension_numbers = #tpu.dot_dimension_numbers<[1], [0], [0], [1], [0, 0, 1, 1], [], []>} : vector<2x32xf32>, vector<32x128xf32>, vector<2x128xf32> -> vector<2x128xf32>
    %224 = arith.addf %222, %223 : vector<2x128xf32>
    %225 = vector.extract_strided_slice %224 {offsets = [0, 0], sizes = [2, 96], strides = [1, 1]} : vector<2x128xf32> to vector<2x96xf32>
    %226 = arith.negf %225 : vector<2x96xf32>
    %227 = math.exp %226 : vector<2x96xf32>
    %cst_38 = arith.constant 1.000000e+00 : f32
    %228 = vector.broadcast %cst_38 : f32 to vector<2x96xf32>
    %229 = arith.addf %228, %227 : vector<2x96xf32>
    %230 = arith.divf %228, %229 : vector<2x96xf32>
    %231 = vector.extract_strided_slice %224 {offsets = [0, 96], sizes = [2, 32], strides = [1, 1]} : vector<2x128xf32> to vector<2x32xf32>
    %232 = math.tanh %231 : vector<2x32xf32>
    %233 = vector.extract_strided_slice %230 {offsets = [0, 0], sizes = [2, 32], strides = [1, 1]} : vector<2x96xf32> to vector<2x32xf32>
    %234 = vector.extract_strided_slice %230 {offsets = [0, 32], sizes = [2, 32], strides = [1, 1]} : vector<2x96xf32> to vector<2x32xf32>
    %235 = vector.extract_strided_slice %230 {offsets = [0, 64], sizes = [2, 32], strides = [1, 1]} : vector<2x96xf32> to vector<2x32xf32>
    %236 = arith.mulf %234, %198 : vector<2x32xf32>
    %237 = arith.mulf %233, %232 : vector<2x32xf32>
    %238 = arith.addf %236, %237 : vector<2x32xf32>
    %239 = math.tanh %238 : vector<2x32xf32>
    %240 = arith.mulf %235, %239 : vector<2x32xf32>
    %241 = tpu.concatenate %240, %220 in 1 : vector<2x32xf32>, vector<2x32xf32> -> vector<2x64xf32>
    %cst_39 = arith.constant dense<0.000000e+00> : vector<2x128xf32>
    %242 = tpu.matmul %241, %3, %cst_39 {dimension_numbers = #tpu.dot_dimension_numbers<[1], [0], [0], [1], [0, 0, 1, 1], [], []>} : vector<2x64xf32>, vector<64x128xf32>, vector<2x128xf32> -> vector<2x128xf32>
    %243 = vector.broadcast %4 : vector<1x128xf32> to vector<2x128xf32>
    %244 = arith.addf %242, %243 : vector<2x128xf32>
    %245 = vector.extract_strided_slice %244 {offsets = [0, 0], sizes = [2, 96], strides = [1, 1]} : vector<2x128xf32> to vector<2x96xf32>
    %246 = arith.negf %245 : vector<2x96xf32>
    %247 = math.exp %246 : vector<2x96xf32>
    %cst_40 = arith.constant 1.000000e+00 : f32
    %248 = vector.broadcast %cst_40 : f32 to vector<2x96xf32>
    %249 = arith.addf %248, %247 : vector<2x96xf32>
    %250 = arith.divf %248, %249 : vector<2x96xf32>
    %251 = vector.extract_strided_slice %244 {offsets = [0, 96], sizes = [2, 32], strides = [1, 1]} : vector<2x128xf32> to vector<2x32xf32>
    %252 = math.tanh %251 : vector<2x32xf32>
    %253 = vector.extract_strided_slice %250 {offsets = [0, 0], sizes = [2, 32], strides = [1, 1]} : vector<2x96xf32> to vector<2x32xf32>
    %254 = vector.extract_strided_slice %250 {offsets = [0, 32], sizes = [2, 32], strides = [1, 1]} : vector<2x96xf32> to vector<2x32xf32>
    %255 = vector.extract_strided_slice %250 {offsets = [0, 64], sizes = [2, 32], strides = [1, 1]} : vector<2x96xf32> to vector<2x32xf32>
    %256 = arith.mulf %254, %218 : vector<2x32xf32>
    %257 = arith.mulf %253, %252 : vector<2x32xf32>
    %258 = arith.addf %256, %257 : vector<2x32xf32>
    %259 = math.tanh %258 : vector<2x32xf32>
    %260 = arith.mulf %255, %259 : vector<2x32xf32>
    %261 = vector.extract_strided_slice %12 {offsets = [0, 6, 0], sizes = [2, 1, 128], strides = [1, 1, 1]} : vector<2x8x128xf32> to vector<2x1x128xf32>
    %262 = vector.shape_cast %261 : vector<2x1x128xf32> to vector<2x128xf32>
    %cst_41 = arith.constant dense<0.000000e+00> : vector<2x128xf32>
    %263 = tpu.matmul %240, %1, %cst_41 {dimension_numbers = #tpu.dot_dimension_numbers<[1], [0], [0], [1], [0, 0, 1, 1], [], []>} : vector<2x32xf32>, vector<32x128xf32>, vector<2x128xf32> -> vector<2x128xf32>
    %264 = arith.addf %262, %263 : vector<2x128xf32>
    %265 = vector.extract_strided_slice %264 {offsets = [0, 0], sizes = [2, 96], strides = [1, 1]} : vector<2x128xf32> to vector<2x96xf32>
    %266 = arith.negf %265 : vector<2x96xf32>
    %267 = math.exp %266 : vector<2x96xf32>
    %cst_42 = arith.constant 1.000000e+00 : f32
    %268 = vector.broadcast %cst_42 : f32 to vector<2x96xf32>
    %269 = arith.addf %268, %267 : vector<2x96xf32>
    %270 = arith.divf %268, %269 : vector<2x96xf32>
    %271 = vector.extract_strided_slice %264 {offsets = [0, 96], sizes = [2, 32], strides = [1, 1]} : vector<2x128xf32> to vector<2x32xf32>
    %272 = math.tanh %271 : vector<2x32xf32>
    %273 = vector.extract_strided_slice %270 {offsets = [0, 0], sizes = [2, 32], strides = [1, 1]} : vector<2x96xf32> to vector<2x32xf32>
    %274 = vector.extract_strided_slice %270 {offsets = [0, 32], sizes = [2, 32], strides = [1, 1]} : vector<2x96xf32> to vector<2x32xf32>
    %275 = vector.extract_strided_slice %270 {offsets = [0, 64], sizes = [2, 32], strides = [1, 1]} : vector<2x96xf32> to vector<2x32xf32>
    %276 = arith.mulf %274, %238 : vector<2x32xf32>
    %277 = arith.mulf %273, %272 : vector<2x32xf32>
    %278 = arith.addf %276, %277 : vector<2x32xf32>
    %279 = math.tanh %278 : vector<2x32xf32>
    %280 = arith.mulf %275, %279 : vector<2x32xf32>
    %281 = tpu.concatenate %280, %260 in 1 : vector<2x32xf32>, vector<2x32xf32> -> vector<2x64xf32>
    %cst_43 = arith.constant dense<0.000000e+00> : vector<2x128xf32>
    %282 = tpu.matmul %281, %3, %cst_43 {dimension_numbers = #tpu.dot_dimension_numbers<[1], [0], [0], [1], [0, 0, 1, 1], [], []>} : vector<2x64xf32>, vector<64x128xf32>, vector<2x128xf32> -> vector<2x128xf32>
    %283 = vector.broadcast %4 : vector<1x128xf32> to vector<2x128xf32>
    %284 = arith.addf %282, %283 : vector<2x128xf32>
    %285 = vector.extract_strided_slice %284 {offsets = [0, 0], sizes = [2, 96], strides = [1, 1]} : vector<2x128xf32> to vector<2x96xf32>
    %286 = arith.negf %285 : vector<2x96xf32>
    %287 = math.exp %286 : vector<2x96xf32>
    %cst_44 = arith.constant 1.000000e+00 : f32
    %288 = vector.broadcast %cst_44 : f32 to vector<2x96xf32>
    %289 = arith.addf %288, %287 : vector<2x96xf32>
    %290 = arith.divf %288, %289 : vector<2x96xf32>
    %291 = vector.extract_strided_slice %284 {offsets = [0, 96], sizes = [2, 32], strides = [1, 1]} : vector<2x128xf32> to vector<2x32xf32>
    %292 = math.tanh %291 : vector<2x32xf32>
    %293 = vector.extract_strided_slice %290 {offsets = [0, 0], sizes = [2, 32], strides = [1, 1]} : vector<2x96xf32> to vector<2x32xf32>
    %294 = vector.extract_strided_slice %290 {offsets = [0, 32], sizes = [2, 32], strides = [1, 1]} : vector<2x96xf32> to vector<2x32xf32>
    %295 = vector.extract_strided_slice %290 {offsets = [0, 64], sizes = [2, 32], strides = [1, 1]} : vector<2x96xf32> to vector<2x32xf32>
    %296 = arith.mulf %294, %258 : vector<2x32xf32>
    %297 = arith.mulf %293, %292 : vector<2x32xf32>
    %298 = arith.addf %296, %297 : vector<2x32xf32>
    %299 = math.tanh %298 : vector<2x32xf32>
    %300 = arith.mulf %295, %299 : vector<2x32xf32>
    %301 = vector.extract_strided_slice %12 {offsets = [0, 7, 0], sizes = [2, 1, 128], strides = [1, 1, 1]} : vector<2x8x128xf32> to vector<2x1x128xf32>
    %302 = vector.shape_cast %301 : vector<2x1x128xf32> to vector<2x128xf32>
    %cst_45 = arith.constant dense<0.000000e+00> : vector<2x128xf32>
    %303 = tpu.matmul %280, %1, %cst_45 {dimension_numbers = #tpu.dot_dimension_numbers<[1], [0], [0], [1], [0, 0, 1, 1], [], []>} : vector<2x32xf32>, vector<32x128xf32>, vector<2x128xf32> -> vector<2x128xf32>
    %304 = arith.addf %302, %303 : vector<2x128xf32>
    %305 = vector.extract_strided_slice %304 {offsets = [0, 0], sizes = [2, 96], strides = [1, 1]} : vector<2x128xf32> to vector<2x96xf32>
    %306 = arith.negf %305 : vector<2x96xf32>
    %307 = math.exp %306 : vector<2x96xf32>
    %cst_46 = arith.constant 1.000000e+00 : f32
    %308 = vector.broadcast %cst_46 : f32 to vector<2x96xf32>
    %309 = arith.addf %308, %307 : vector<2x96xf32>
    %310 = arith.divf %308, %309 : vector<2x96xf32>
    %311 = vector.extract_strided_slice %304 {offsets = [0, 96], sizes = [2, 32], strides = [1, 1]} : vector<2x128xf32> to vector<2x32xf32>
    %312 = math.tanh %311 : vector<2x32xf32>
    %313 = vector.extract_strided_slice %310 {offsets = [0, 0], sizes = [2, 32], strides = [1, 1]} : vector<2x96xf32> to vector<2x32xf32>
    %314 = vector.extract_strided_slice %310 {offsets = [0, 32], sizes = [2, 32], strides = [1, 1]} : vector<2x96xf32> to vector<2x32xf32>
    %315 = vector.extract_strided_slice %310 {offsets = [0, 64], sizes = [2, 32], strides = [1, 1]} : vector<2x96xf32> to vector<2x32xf32>
    %316 = arith.mulf %314, %278 : vector<2x32xf32>
    %317 = arith.mulf %313, %312 : vector<2x32xf32>
    %318 = arith.addf %316, %317 : vector<2x32xf32>
    %319 = math.tanh %318 : vector<2x32xf32>
    %320 = arith.mulf %315, %319 : vector<2x32xf32>
    %321 = tpu.concatenate %320, %300 in 1 : vector<2x32xf32>, vector<2x32xf32> -> vector<2x64xf32>
    %cst_47 = arith.constant dense<0.000000e+00> : vector<2x128xf32>
    %322 = tpu.matmul %321, %3, %cst_47 {dimension_numbers = #tpu.dot_dimension_numbers<[1], [0], [0], [1], [0, 0, 1, 1], [], []>} : vector<2x64xf32>, vector<64x128xf32>, vector<2x128xf32> -> vector<2x128xf32>
    %323 = vector.broadcast %4 : vector<1x128xf32> to vector<2x128xf32>
    %324 = arith.addf %322, %323 : vector<2x128xf32>
    %325 = vector.extract_strided_slice %324 {offsets = [0, 0], sizes = [2, 96], strides = [1, 1]} : vector<2x128xf32> to vector<2x96xf32>
    %326 = arith.negf %325 : vector<2x96xf32>
    %327 = math.exp %326 : vector<2x96xf32>
    %cst_48 = arith.constant 1.000000e+00 : f32
    %328 = vector.broadcast %cst_48 : f32 to vector<2x96xf32>
    %329 = arith.addf %328, %327 : vector<2x96xf32>
    %330 = arith.divf %328, %329 : vector<2x96xf32>
    %331 = vector.extract_strided_slice %324 {offsets = [0, 96], sizes = [2, 32], strides = [1, 1]} : vector<2x128xf32> to vector<2x32xf32>
    %332 = math.tanh %331 : vector<2x32xf32>
    %333 = vector.extract_strided_slice %330 {offsets = [0, 0], sizes = [2, 32], strides = [1, 1]} : vector<2x96xf32> to vector<2x32xf32>
    %334 = vector.extract_strided_slice %330 {offsets = [0, 32], sizes = [2, 32], strides = [1, 1]} : vector<2x96xf32> to vector<2x32xf32>
    %335 = vector.extract_strided_slice %330 {offsets = [0, 64], sizes = [2, 32], strides = [1, 1]} : vector<2x96xf32> to vector<2x32xf32>
    %336 = arith.mulf %334, %298 : vector<2x32xf32>
    %337 = arith.mulf %333, %332 : vector<2x32xf32>
    %338 = arith.addf %336, %337 : vector<2x32xf32>
    %339 = math.tanh %338 : vector<2x32xf32>
    %340 = arith.mulf %335, %339 : vector<2x32xf32>
    %341 = vector.shape_cast %60 : vector<2x32xf32> to vector<2x1x32xf32>
    %342 = vector.shape_cast %100 : vector<2x32xf32> to vector<2x1x32xf32>
    %343 = vector.shape_cast %140 : vector<2x32xf32> to vector<2x1x32xf32>
    %344 = vector.shape_cast %180 : vector<2x32xf32> to vector<2x1x32xf32>
    %345 = vector.shape_cast %220 : vector<2x32xf32> to vector<2x1x32xf32>
    %346 = vector.shape_cast %260 : vector<2x32xf32> to vector<2x1x32xf32>
    %347 = vector.shape_cast %300 : vector<2x32xf32> to vector<2x1x32xf32>
    %348 = vector.shape_cast %340 : vector<2x32xf32> to vector<2x1x32xf32>
    %349 = tpu.concatenate %341, %342, %343, %344, %345, %346, %347, %348 in 1 : vector<2x1x32xf32>, vector<2x1x32xf32>, vector<2x1x32xf32>, vector<2x1x32xf32>, vector<2x1x32xf32>, vector<2x1x32xf32>, vector<2x1x32xf32>, vector<2x1x32xf32> -> vector<2x8x32xf32>
    %350 = vector.shape_cast %6 : vector<1x32xf32> to vector<1x1x32xf32>
    %351 = vector.broadcast %350 : vector<1x1x32xf32> to vector<2x8x32xf32>
    %352 = arith.mulf %349, %351 : vector<2x8x32xf32>
    %cst_49 = arith.constant dense<0.000000e+00> : vector<2x8xf32>
    %353 = vector.multi_reduction <add>, %352, %cst_49 [2] : vector<2x8x32xf32> to vector<2x8xf32>
    %354 = vector.broadcast %7 : vector<1x1xf32> to vector<2x8xf32>
    %355 = arith.addf %353, %354 : vector<2x8xf32>
    %c0_50 = arith.constant 0 : index
    %c0_51 = arith.constant 0 : index
    %356 = vector.load %arg3[%c0_50, %c0_51] : memref<2x8xf32, #tpu.memory_space<vmem>>, vector<2x8xf32>
    tpu.vector_store %arg3[%c0_50, %c0_51], %355 {strides = array<i32>} : memref<2x8xf32, #tpu.memory_space<vmem>>, vector<2x8xf32>,
    return
  }
}

</mosaic_0001>

<bundles_post_ra>
// kernel: lstm_net_forward.1
= control target key start
LH: loop header
LB: loop body
LE: loop exit
PB: predicated region body
PF: predicated region fallthrough
CT: control target
= control target key end

     0   :  { %8 = vsyncpa [#allocation3], 0  ;;  %s3842_s0 = inlined_call_operand.vmem [shape: f32[16,4], index: 0, kind: input, shape index: {}]   ;;  %s3843_s1 = inlined_call_operand.hbm [shape: f32[128,128], index: 1, kind: input, shape index: {}]   ;;  %s3844_s2 = inlined_call_operand.vmem [shape: f32[4,2,32], index: 2, kind: input, shape index: {}]   ;;  %s3845_s3 = inlined_call_operand.hbm [shape: f32[2,8], index: 3, kind: output, shape index: {}]  }
   0x1   :  { %9 = vsyncpa [#allocation4], 0  ;;  %s3285_s12 = smov [#allocation2]   ;;  %s3237_s16 = scalar_lea.hbm %s3843_s1, 2048 }
   0x2   :  { %s17_s13 = sshll.u32 %s3285_s12, 4  ;;  %p3238_p0 = scmp.ne.s32.totalorder %s3843_s1, %s3237_s16  ;;  %s18_s13 = int_to_ptr.vmem [resolvable:$true] %s17_s13 }
   0x3   :  { %p3241_p1 = scmp.lt.u32.totalorder %s3237_s16, %s3843_s1 }
   0x5   :  { %p3243_p2 = pnand %p3241_p1, %p3238_p0 }
   0x7   :  { %3246 = shalt.err (!%p3243_p2)
}
   0x8   :  { %s3247_s21 = scalar_lea.vmem %s18_s13, 2048  ;;  %p3252_p4 = scmp.lt.s32.totalorder %s18_s13, %s18_s13 }
   0x9   :  { %p3248_p3 = scmp.ne.s32.totalorder %s18_s13, %s3247_s21  ;;  %p3253_p5 = scmp.lt.s32.totalorder %s3247_s21, %s3247_s21 }
   0xb   :  { %p3254_p6 = por %p3253_p5, %p3252_p4 }
   0xd   :  { %p3255_p7 = pnand %p3254_p6, %p3248_p3 }
   0xf   :  { %3258 = shalt.err (!%p3255_p7)
}
  0x10   :  { %s3286_s22 = smov 128   ;;  %s3287_s23 = smov 8  }
  0x11   :  { %23 = dma.hbm_to_vmem [thread:$0]  %s3843_s1, 2048, %s18_s13, [#allocation3], %s3286_s22, %s3286_s22, %s3287_s23  }
  0x12   :  { %3281 = dma.done.wait [#allocation3], 2048  }
  0x13   :  { %3282 = vsyncadd [#allocation3], 4294965248  ;;  %v3288_v0 = vmov 0.0|0.0   ;;  %vm3289_vm0 = vmmov 0   ;;  %v3290_v1 = vmov 0.0   ;;  %vm58_vm1 = vcmask 1043456  }
  0x14   :  { %2905 = vmatprep.subr.bf16.mxu1 %v3288_v0  ;;  %2685 = vmatprep.mubr.msk.f32.mxu1 %vm3289_vm0, %v3290_v1  ;;  %vm51_vm2 = vcmask 31744   ;;  %v29_v2 = vld [vmem:[#allocation2] sm:$0xf]  ;;  %v46_v4 = vld [vmem:[%s3842_s0 + $0x8] sm:$0xff]  ;;  %v31_v6 = vld [vmem:[#allocation2 + $0x10] sm:$0xff]  ;;  %vm144_vm3 = vcmask 261120  }
  0x15   :  { %v45_v3 = vld [vmem:[%s3842_s0] sm:$0xff]  ;;  %2642 = vmatprep.subr.msk.mxu0 %vm58_vm1, %v29_v2  ;;  %v30_v5 = vld [vmem:[#allocation2 + $0x8] sm:$0xff]  ;;  %v32_v7 = vld [vmem:[#allocation2 + $0x18] sm:$0xff]  ;;  %s3291_s0 = smov 32   ;;  %vm283_vm4 = vcmask 1041409   ;;  %s3292_s8 = smov 64  }
  0x16   :  { %2644 = vmatprep.mubr.msk.f32.mxu0 %vm51_vm2, %v45_v3  ;;  %2643 = vmatpush3.msk.msra.mxu0 %vm58_vm1, %v29_v2  ;;  %v3339_v8 = vpack.c.bf16 %v31_v6, %v30_v5  ;;  %v33_v9 = vld [vmem:[#allocation2 + $0x20] sm:$0xff]  ;;  %v2479_v16 = vld [vmem:[#allocation2 + $0x28] ss:$0 sm:$0xff]  ;;  %v35_v46 = vld [vmem:[#allocation2 + $0x30] sm:$0xff]  ;;  %vm297_vm5 = vcmask 523264   ;;  %vm534_vm6 = vcmask 1042434  }
  0x17   :  { %v2484_v10 = vld [vmem:[%s3844_s2 + $0x4] sm:$0x3]  ;;  %2645 = vmatmul.mubr.msk.f32.vlgmr.msra.gmra.mrb[0].mxu0 %vm51_vm2, %v46_v4  ;;  %2887 = vmatprep.subr.bf16.mxu0 %v3288_v0  ;;  %v3346_v12 = vpack.c.bf16 %v33_v9, %v32_v7  ;;  %v137_v13 = vld [vmem:[%s3844_s2] sm:$0x3]  ;;  %v36_v47 = vld [vmem:[#allocation2 + $0x38] sm:$0xff]  ;;  %vm783_vm7 = vcmask 1043459  }
  0x18   :  { %v239_v11 = vrot.slane %v2484_v10, 1  ;;  %2889 = vmatpush3.bf16.msra.mxu0 %v3339_v8  ;;  %2655 = vmatprep.mubr.msk.f32.mxu0 %vm3289_vm0, %v3290_v1  ;;  %v37_v48 = vld [vmem:[#allocation2 + $0x40] sm:$0xff]  ;;  %v3381_v49 = vpack.c.bf16 %v36_v47, %v35_v46  ;;  %v38_v50 = vld [vmem:[#allocation2 + $0x48] sm:$0xff]  ;;  %v39_v52 = vld [vmem:[#allocation2 + $0x50] sm:$0xff]  ;;  %vm2048_vm8 = vcmask 1040384   ;;  %vm1033_vm9 = vcmask 1044484  }
  0x19   :  { %2890 = vmatprep.subr.bf16.mxu0 %v3288_v0  ;;  %2907 = vmatpush3.bf16.msra.mxu1 %v3339_v8  ;;  %v3384_v51 = vpack.c.bf16 %v38_v50, %v37_v48  ;;  %v40_v53 = vld [vmem:[#allocation2 + $0x58] sm:$0xff]  ;;  %v41_v56 = vld [vmem:[#allocation2 + $0x60] sm:$0xff]  ;;  %v42_v57 = vld [vmem:[#allocation2 + $0x68] sm:$0xff]  ;;  %vm2399_vm10 = vcmask 1041408   ;;  %vm1283_vm11 = vcmask 1045509   ;;  %vm2402_vm12 = vcmask 1042432  }
  0x1a   :  { %242 = vrot.lane.b32.xlu1 %v239_v11, %s3291_s0  ;;  %2908 = vmatprep.subr.bf16.mxu1 %v3288_v0  ;;  %v3389_v55 = vpack.c.bf16 %v40_v53, %v39_v52  ;;  %v2483_v59 = vld [vmem:[%s3844_s2 + $0x2] sm:$0x3]  ;;  %v3397_v60 = vpack.c.bf16 %v42_v57, %v41_v56  ;;  %vm1533_vm13 = vcmask 1046534   ;;  %vm1783_vm14 = vcmask 1047559   ;;  %s3295_s12 = smov [#allocation5]  }
  0x1b   :  { %vm2407_vm15 = vcmask 1044480   ;;  %s2470_s13 = sshll.u32 %s3295_s12, 4  ;;  %vm2462_vm2 = vcmask 58368   ;;  %s2471_s13 = int_to_ptr.vmem [resolvable:$true] %s2470_s13 }
  0x1c   :  { %2892 = vmatpush3.bf16.msra.mxu0 %v3346_v12  ;;  %s3259_s14 = scalar_lea.vmem %s2471_s13, 32  ;;  %p3264_p9 = scmp.lt.s32.totalorder %s2471_s13, %s2471_s13 }
  0x1d   :  { %2893 = vmatprep.subr.bf16.mxu0 %v3288_v0  ;;  %2910 = vmatpush3.bf16.msra.mxu1 %v3346_v12  ;;  %p3260_p8 = scmp.ne.s32.totalorder %s2471_s13, %s3259_s14  ;;  %p3265_p10 = scmp.lt.s32.totalorder %s3259_s14, %s3259_s14 }
  0x1e   :  { %240 = vrot.lane.b32.xlu1 %v2484_v10, %s3291_s0  ;;  %2911 = vmatprep.subr.bf16.mxu1 %v3288_v0 }
  0x1f   :  { %2656 = vmatmul.mubr.msk.f32.vlgmr.msra.gmra.mrb[2].mxu0 %vm144_vm3, %v137_v13  ;;  %p3266_p11 = por %p3265_p10, %p3264_p9 }
  0x20   :  { %2674 = vmatprep.mubr.msk.f32.mxu0 %vm3289_vm0, %v3290_v1  ;;  %2895 = vmatpush3.bf16.msra.mxu0 %v3381_v49 }
  0x21   :  { %2896 = vmatprep.subr.bf16.mxu0 %v3288_v0  ;;  %p3267_p12 = pnand %p3266_p11, %p3260_p8 }
  0x24   :  { %2898 = vmatpush3.bf16.msra.mxu0 %v3384_v51 }
  0x25   :  { %2899 = vmatprep.subr.bf16.mxu0 %v3288_v0 }
  0x28   :  { %2901 = vmatpush3.bf16.msra.mxu0 %v3389_v55 }
  0x29   :  { %2902 = vmatprep.subr.bf16.mxu0 %v3288_v0 }
  0x2c   :  { %2904 = vmatpush3.bf16.msra.mxu0 %v3397_v60 }
  0x2d   :  { %2923 = vmatprep.subr.bf16.mxu0 %v3288_v0 }
  0x8c   :  { %v243_v38 = vpop.permute.xlu1 %242 }
  0x90   :  { %v241_v40 = vpop.permute.xlu1 %240 }
  0xea   :  { %v2646_v14 = vpop.f32.mrb[0].mxu0 }
  0xeb   :  { %v128_v15 = vpop.f32.mrb[1].mxu0  ;;  %v3365_v18 = vadd.f32 %v2646_v14, %v2479_v16 }
  0xec   :  { %v3368_v22 = vadd.f32 %v2479_v16, %v128_v15 }
  0xf2   :  { %v214_v17 = vpop.f32.mrb[2].mxu0 }
  0xf3   :  { %v219_v19 = vrot.slane %v214_v17, 1  ;;  %v2657_v20 = vpop.f32.mrb[3].mxu0  ;;  %v222_v23 = vadd.f32 %v214_v17, %v3368_v22  ;;  %v3426_v17 = vld [vmem:[#allocation2 + $0x70] ss:$0 sm:$0xff] }
  0xf5   :  { %v223_v21 = vadd.f32 %v219_v19, %v3365_v18  ;;  %v2487_v27 = vmul.f32 -1.442695, %v222_v23 }
  0xf7   :  { %3044 = vtanh.f32 %v223_v21  ;;  %v2488_v26 = vmul.f32 -1.442695, %v223_v21  ;;  %v2485_v21 = vld [vmem:[%s3844_s2 + $0x6] sm:$0x3]  ;;  %s3293_s2 = smov 96  }
  0xf8   :  { %3046 = vtanh.f32 %v222_v23 }
  0xf9   :  { %3048 = vpow2.f32 %v2488_v26 }
  0xfa   :  { %3050 = vpow2.f32 %v2487_v27 }
 0x101   :  { %v3045_v24 = vpop.eup %3044 }
 0x102   :  { %252 = vrot.lane.b32.xlu0 %v3045_v24, %s3291_s0  ;;  %v3047_v25 = vpop.eup %3046 }
 0x103   :  { %v3049_v28 = vpop.eup %3048 }
 0x104   :  { %v231_v29 = vadd.f32 1.0, %v3049_v28  ;;  %v3051_v30 = vpop.eup %3050 }
 0x105   :  { %v230_v31 = vadd.f32 1.0, %v3051_v30 }
 0x106   :  { %250 = vrot.lane.b32.xlu0 %v3047_v25, %s3291_s0  ;;  %3052 = vrcp.f32 %v231_v29 }
 0x107   :  { %3054 = vrcp.f32 %v230_v31 }
 0x110   :  { %v3053_v32 = vpop.eup %3052 }
 0x111   :  { %v3055_v35 = vpop.eup %3054  ;;  %v247_v39 = vmul.f32 %v3053_v32, %v243_v38 }
 0x112   :  { %v246_v43 = vmul.f32 %v3055_v35, %v241_v40 }
 0x174   :  { %v253_v33 = vpop.permute.xlu0 %252 }
 0x175   :  { %v257_v34 = vmul.f32 %v3053_v32, %v253_v33 }
 0x177   :  { %262 = vrot.lane.b32.xlu0 %v257_v34, %s3291_s0 }
 0x178   :  { %v251_v36 = vpop.permute.xlu0 %250 }
 0x179   :  { %v256_v37 = vmul.f32 %v3055_v35, %v251_v36 }
 0x17b   :  { %260 = vrot.lane.b32.xlu1 %v256_v37, %s3291_s0 }
 0x1e9   :  { %v263_v41 = vpop.permute.xlu0 %262 }
 0x1ea   :  { %v3375_v42 = vadd.f32 %v263_v41, %v247_v39 }
 0x1ec   :  { %3056 = vtanh.f32 %v3375_v42  ;;  %v494_v46 = vrot.slane %v3375_v42, 7 }
 0x1ed   :  { %v261_v44 = vpop.permute.xlu1 %260 }
 0x1ee   :  { %v3378_v45 = vadd.f32 %v261_v44, %v246_v43 }
 0x1f0   :  { %3058 = vtanh.f32 %v3378_v45  ;;  %v493_v48 = vrot.slane %v3378_v45, 7 }
 0x1f6   :  { %v3057_v54 = vpop.eup %3056 }
 0x1f7   :  { %274 = vrot.lane.b32.xlu0 %v3057_v54, %s3291_s0 }
 0x1fa   :  { %v3059_v58 = vpop.eup %3058 }
 0x1fb   :  { %272 = vrot.lane.b32.xlu1 %v3059_v58, %s3291_s0 }
 0x1ff   :  { %289 = vrot.lane.b32.xlu1 %v2483_v59, %s3291_s0 }
 0x269   :  { %v275_v61 = vpop.permute.xlu0 %274 }
 0x26a   :  { %v279_v62 = vmul.f32 %v3053_v32, %v275_v61 }
 0x26c   :  { %v282_v2 = vrot.slane %v279_v62, 7 }
 0x26d   :  { %v273_v63 = vpop.permute.xlu1 %272 }
 0x26e   :  { %v278_v3 = vmul.f32 %v3055_v35, %v273_v63 }
 0x270   :  { %v284_v4 = vsel %vm283_vm4, %v282_v2, %v278_v3 }
 0x271   :  { %285 = vrot.lane.b32.xlu0 %v284_v4, %s3292_s8  ;;  %v290_v5 = vpop.permute.xlu1 %289 }
 0x2e3   :  { %v286_v6 = vpop.permute.xlu0 %285 }
 0x2e4   :  { %v292_v7 = vsel %vm144_vm3, %v286_v6, %v290_v5  ;;  %2686 = vmatmul.mubr.msk.f32.vlgmr.msra.gmra.mrb[0].mxu1 %vm144_vm3, %v286_v6 }
 0x2e5   :  { %2675 = vmatmul.mubr.msk.f32.vlgmr.msra.gmra.mrb[4].mxu0 %vm297_vm5, %v292_v7  ;;  %2913 = vmatpush3.bf16.msra.mxu1 %v3381_v49 }
 0x2e6   :  { %2914 = vmatprep.subr.bf16.mxu1 %v3288_v0  ;;  %2925 = vmatpush3.bf16.msra.mxu0 %v3339_v8 }
 0x2e7   :  { %2926 = vmatprep.subr.bf16.mxu0 %v3288_v0  ;;  %2715 = vmatprep.mubr.msk.f32.mxu0 %vm3289_vm0, %v3290_v1 }
 0x2e8   :  { %2704 = vmatprep.mubr.msk.f32.mxu1 %vm3289_vm0, %v3290_v1 }
 0x2e9   :  { %2916 = vmatpush3.bf16.msra.mxu1 %v3384_v51 }
 0x2ea   :  { %2917 = vmatprep.subr.bf16.mxu1 %v3288_v0  ;;  %2928 = vmatpush3.bf16.msra.mxu0 %v3346_v12 }
 0x2eb   :  { %2929 = vmatprep.subr.bf16.mxu0 %v3288_v0 }
 0x2ed   :  { %2919 = vmatpush3.bf16.msra.mxu1 %v3389_v55 }
 0x2ee   :  { %2920 = vmatprep.subr.bf16.mxu1 %v3288_v0 }
 0x2f1   :  { %2922 = vmatpush3.bf16.msra.mxu1 %v3397_v60 }
 0x2f2   :  { %2941 = vmatprep.subr.bf16.mxu1 %v3288_v0 }
 0x3b7   :  { %v467_v9 = vpop.f32.mrb[0].mxu1 }
 0x3b8   :  { %v472_v10 = vrot.slane %v467_v9, 7  ;;  %v476_v11 = vadd.f32 %v467_v9, %v3365_v18  ;;  %v367_v13 = vpop.f32.mrb[4].mxu0  ;;  %v2687_v14 = vpop.f32.mrb[1].mxu1 }
 0x3b9   :  { %v2676_v15 = vpop.f32.mrb[5].mxu0  ;;  %v368_v19 = vadd.f32 %v3426_v17, %v367_v13 }
 0x3ba   :  { %v475_v16 = vadd.f32 %v472_v10, %v3368_v22  ;;  %3060 = vtanh.f32 %v476_v11  ;;  %v2494_v25 = vmul.f32 -1.442695, %v476_v11 }
 0x3bb   :  { %v2491_v27 = vmul.f32 -1.442695, %v368_v19 }
 0x3bc   :  { %3062 = vtanh.f32 %v475_v16  ;;  %v2493_v26 = vmul.f32 -1.442695, %v475_v16 }
 0x3bd   :  { %3064 = vtanh.f32 %v368_v19 }
 0x3be   :  { %3066 = vpow2.f32 %v2494_v25 }
 0x3bf   :  { %3068 = vpow2.f32 %v2493_v26 }
 0x3c0   :  { %3070 = vpow2.f32 %v2491_v27 }
 0x3c4   :  { %v3061_v20 = vpop.eup %3060 }
 0x3c5   :  { %503 = vrot.lane.b32.xlu1 %v3061_v20, %s3291_s0 }
 0x3c6   :  { %v3063_v23 = vpop.eup %3062 }
 0x3c7   :  { %501 = vrot.lane.b32.xlu0 %v3063_v23, %s3291_s0  ;;  %v3065_v24 = vpop.eup %3064 }
 0x3c8   :  { %v3067_v28 = vpop.eup %3066 }
 0x3c9   :  { %379 = vrot.lane.b32.xlu1 %v2485_v21, %s3291_s0  ;;  %v3069_v29 = vpop.eup %3068  ;;  %v484_v30 = vadd.f32 1.0, %v3067_v28 }
 0x3ca   :  { %v483_v31 = vadd.f32 1.0, %v3069_v29  ;;  %v3071_v32 = vpop.eup %3070 }
 0x3cb   :  { %384 = vrot.lane.b32.xlu0 %v3065_v24, %s3291_s0  ;;  %3072 = vrcp.f32 %v484_v30  ;;  %v374_v33 = vadd.f32 1.0, %v3071_v32 }
 0x3cc   :  { %3074 = vrcp.f32 %v483_v31 }
 0x3cd   :  { %3076 = vrcp.f32 %v374_v33 }
 0x3d5   :  { %v3073_v34 = vpop.eup %3072 }
 0x3d6   :  { %v3075_v37 = vpop.eup %3074  ;;  %v498_v47 = vmul.f32 %v3073_v34, %v494_v46 }
 0x3d7   :  { %v3077_v40 = vpop.eup %3076  ;;  %v497_v53 = vmul.f32 %v3075_v37, %v493_v48 }
 0x437   :  { %v504_v35 = vpop.permute.xlu1 %503 }
 0x438   :  { %v508_v36 = vmul.f32 %v3073_v34, %v504_v35 }
 0x439   :  { %v502_v38 = vpop.permute.xlu0 %501 }
 0x43a   :  { %513 = vrot.lane.b32.xlu1 %v508_v36, %s3291_s0  ;;  %v507_v39 = vmul.f32 %v3075_v37, %v502_v38 }
 0x43b   :  { %v380_v44 = vpop.permute.xlu1 %379 }
 0x43c   :  { %511 = vrot.lane.b32.xlu0 %v507_v39, %s3291_s0  ;;  %v382_v57 = vmul.f32 %v3077_v40, %v380_v44 }
 0x43d   :  { %v385_v41 = vpop.permute.xlu0 %384 }
 0x43e   :  { %v387_v43 = vmul.f32 %v3077_v40, %v385_v41 }
 0x440   :  { %389 = vrot.lane.b32.xlu0 %v387_v43, %s3291_s0 }
 0x4ac   :  { %v514_v50 = vpop.permute.xlu1 %513 }
 0x4ad   :  { %v3441_v52 = vadd.f32 %v514_v50, %v498_v47 }
 0x4ae   :  { %v512_v54 = vpop.permute.xlu0 %511 }
 0x4af   :  { %3078 = vtanh.f32 %v3441_v52  ;;  %v3444_v56 = vadd.f32 %v512_v54, %v497_v53 }
 0x4b1   :  { %3080 = vtanh.f32 %v3444_v56 }
 0x4b2   :  { %v390_v58 = vpop.permute.xlu0 %389 }
 0x4b3   :  { %v3447_v59 = vadd.f32 %v390_v58, %v382_v57  ;;  %v742_v58 = vrot.slane %v3444_v56, 7 }
 0x4b5   :  { %3082 = vtanh.f32 %v3447_v59 }
 0x4b9   :  { %v3079_v42 = vpop.eup %3078 }
 0x4ba   :  { %525 = vrot.lane.b32.xlu0 %v3079_v42, %s3291_s0  ;;  %v743_v42 = vrot.slane %v3441_v52, 7 }
 0x4bb   :  { %v3081_v45 = vpop.eup %3080 }
 0x4bc   :  { %523 = vrot.lane.b32.xlu1 %v3081_v45, %s3291_s0 }
 0x4bf   :  { %v3083_v61 = vpop.eup %3082 }
 0x4c0   :  { %395 = vrot.lane.b32.xlu1 %v3083_v61, %s3291_s0 }
 0x52c   :  { %v526_v62 = vpop.permute.xlu0 %525 }
 0x52d   :  { %v530_v63 = vmul.f32 %v3073_v34, %v526_v62 }
 0x52e   :  { %v524_v3 = vpop.permute.xlu1 %523 }
 0x52f   :  { %v533_v2 = vrot.slane %v530_v63, 7  ;;  %v529_v4 = vmul.f32 %v3075_v37, %v524_v3 }
 0x531   :  { %v643_v5 = vrot.slane %v529_v4, 1  ;;  %v535_v6 = vsel %vm534_vm6, %v533_v2, %v529_v4 }
 0x532   :  { %536 = vrot.lane.b32.xlu0 %v535_v6, %s3292_s8  ;;  %v396_v7 = vpop.permute.xlu1 %395 }
 0x533   :  { %v3454_v9 = vmul.f32 %v3077_v40, %v396_v7  ;;  %v644_v11 = vsel %vm283_vm4, %v530_v63, %v643_v5 }
 0x535   :  { %v540_v10 = vrot.slane %v3454_v9, 7 }
 0x536   :  { %645 = vrot.lane.b32.xlu0 %v644_v11, %s3292_s8 }
 0x537   :  { %541 = vrot.lane.b32.xlu1 %v540_v10, %s3293_s2  ;;  %v3294_v10 = vmov 1966171168  }
 0x538   :  { %v2149_v11 = vunpack.c.l.s4 %v3294_v10 }
 0x5a4   :  { %v537_v13 = vpop.permute.xlu0 %536 }
 0x5a8   :  { %v646_v14 = vpop.permute.xlu0 %645 }
 0x5a9   :  { %2716 = vmatmul.mubr.msk.f32.vlgmr.msra.gmra.mrb[6].mxu0 %vm144_vm3, %v646_v14  ;;  %v542_v15 = vpop.permute.xlu1 %541  ;;  %v2150_v14 = vunpack.c.0.s8 %v2149_v11 }
 0x5aa   :  { %v544_v16 = vsel %vm144_vm3, %v537_v13, %v542_v15  ;;  %2931 = vmatpush3.bf16.msra.mxu0 %v3381_v49  ;;  %2734 = vmatprep.mubr.msk.f32.mxu0 %vm3289_vm0, %v3290_v1  ;;  %v2151_v13 = vlaneseq }
 0x5ab   :  { %v546_v19 = vrot.slane %v544_v16, 1  ;;  %2932 = vmatprep.subr.bf16.mxu0 %v3288_v0 }
 0x5ad   :  { %2705 = vmatmul.mubr.msk.f32.vlgmr.msra.gmra.mrb[2].mxu1 %vm297_vm5, %v546_v19 }
 0x5ae   :  { %2934 = vmatpush3.bf16.msra.mxu0 %v3384_v51  ;;  %2943 = vmatpush3.bf16.msra.mxu1 %v3339_v8 }
 0x5af   :  { %2935 = vmatprep.subr.bf16.mxu0 %v3288_v0  ;;  %2944 = vmatprep.subr.bf16.mxu1 %v3288_v0 }
 0x5b0   :  { %2745 = vmatprep.mubr.msk.f32.mxu1 %vm3289_vm0, %v3290_v1 }
 0x5b2   :  { %2937 = vmatpush3.bf16.msra.mxu0 %v3389_v55  ;;  %2946 = vmatpush3.bf16.msra.mxu1 %v3346_v12 }
 0x5b3   :  { %2938 = vmatprep.subr.bf16.mxu0 %v3288_v0  ;;  %2947 = vmatprep.subr.bf16.mxu1 %v3288_v0 }
 0x5b6   :  { %2940 = vmatpush3.bf16.msra.mxu0 %v3397_v60 }
 0x5b7   :  { %2959 = vmatprep.subr.bf16.mxu0 %v3288_v0 }
 0x67c   :  { %v715_v20 = vpop.f32.mrb[6].mxu0 }
 0x67d   :  { %v720_v21 = vrot.slane %v715_v20, 6  ;;  %v721_v23 = vrot.slane %v715_v20, 7  ;;  %v2717_v24 = vpop.f32.mrb[7].mxu0 }
 0x67f   :  { %v724_v25 = vadd.f32 %v720_v21, %v3368_v22  ;;  %v725_v26 = vadd.f32 %v721_v23, %v3365_v18 }
 0x680   :  { %v615_v27 = vpop.f32.mrb[2].mxu1 }
 0x681   :  { %3084 = vtanh.f32 %v724_v25  ;;  %v2706_v28 = vpop.f32.mrb[3].mxu1  ;;  %v616_v29 = vadd.f32 %v3426_v17, %v615_v27  ;;  %v2498_v33 = vmul.f32 -1.442695, %v724_v25  ;;  %v2499_v34 = vmul.f32 -1.442695, %v725_v26 }
 0x682   :  { %3086 = vtanh.f32 %v725_v26 }
 0x683   :  { %3088 = vtanh.f32 %v616_v29  ;;  %v2496_v35 = vmul.f32 -1.442695, %v616_v29 }
 0x684   :  { %3090 = vpow2.f32 %v2498_v33 }
 0x685   :  { %3092 = vpow2.f32 %v2499_v34 }
 0x686   :  { %3094 = vpow2.f32 %v2496_v35 }
 0x68b   :  { %v3085_v30 = vpop.eup %3084 }
 0x68c   :  { %v3087_v31 = vpop.eup %3086  ;;  %750 = vrot.lane.b32.xlu1 %v3085_v30, %s3291_s0 }
 0x68d   :  { %752 = vrot.lane.b32.xlu0 %v3087_v31, %s3291_s0  ;;  %v3089_v32 = vpop.eup %3088 }
 0x68e   :  { %v3091_v36 = vpop.eup %3090 }
 0x68f   :  { %v3093_v37 = vpop.eup %3092  ;;  %v732_v38 = vadd.f32 1.0, %v3091_v36 }
 0x690   :  { %628 = vrot.lane.b32.xlu1 %v3089_v32, %s3291_s0  ;;  %v733_v39 = vadd.f32 1.0, %v3093_v37  ;;  %v3095_v40 = vpop.eup %3094 }
 0x691   :  { %3096 = vrcp.f32 %v732_v38  ;;  %v622_v41 = vadd.f32 1.0, %v3095_v40 }
 0x692   :  { %3098 = vrcp.f32 %v733_v39 }
 0x693   :  { %3100 = vrcp.f32 %v622_v41 }
 0x69b   :  { %v3097_v43 = vpop.eup %3096 }
 0x69c   :  { %v3099_v46 = vpop.eup %3098  ;;  %v746_v45 = vmul.f32 %v3097_v43, %v742_v58 }
 0x69d   :  { %v3101_v53 = vpop.eup %3100  ;;  %v747_v62 = vmul.f32 %v3099_v46, %v743_v42 }
 0x69e   :  { %v626_v4 = vmul.f32 %v3101_v53, %v3447_v59  ;;  %v3504_v59 = vshrl.u32 %v2151_v13, 7 }
 0x6a0   :  { %v3507_v16 = vsub.s32 %v2150_v14, %v3504_v59  ;;  %v3513_v30 = vsub.s32 0, %v3504_v59 }
 0x6a2   :  { %v2154_v24 = vrot.slane %v3454_v9, %v3507_v16 }
 0x6a4   :  { %v2155_v33 = vcombine.high %v2154_v24, %v2154_v24  ;;  %v2162_v36 = vrot.slane %v2154_v24, %v3507_v16 }
 0x6a6   :  { %v2169_v39 = vrot.slane %v2155_v33, %v3507_v16 }
 0x6fe   :  { %v751_v44 = vpop.permute.xlu1 %750 }
 0x6ff   :  { %v753_v47 = vpop.permute.xlu0 %752  ;;  %v756_v48 = vmul.f32 %v3097_v43, %v751_v44 }
 0x700   :  { %v757_v50 = vmul.f32 %v3099_v46, %v753_v47 }
 0x701   :  { %760 = vrot.lane.b32.xlu0 %v756_v48, %s3291_s0 }
 0x702   :  { %762 = vrot.lane.b32.xlu1 %v757_v50, %s3291_s0  ;;  %v629_v54 = vpop.permute.xlu1 %628 }
 0x703   :  { %v631_v57 = vmul.f32 %v3101_v53, %v629_v54 }
 0x705   :  { %633 = vrot.lane.b32.xlu0 %v631_v57, %s3291_s0 }
 0x773   :  { %v761_v61 = vpop.permute.xlu0 %760 }
 0x774   :  { %v3490_v63 = vadd.f32 %v761_v61, %v746_v45  ;;  %v763_v2 = vpop.permute.xlu1 %762 }
 0x775   :  { %v3492_v3 = vadd.f32 %v763_v2, %v747_v62 }
 0x776   :  { %3102 = vtanh.f32 %v3490_v63  ;;  %v992_v33 = vrot.slane %v3490_v63, 7 }
 0x777   :  { %3104 = vtanh.f32 %v3492_v3  ;;  %v634_v5 = vpop.permute.xlu0 %633 }
 0x778   :  { %v3497_v6 = vadd.f32 %v634_v5, %v626_v4 }
 0x77a   :  { %3106 = vtanh.f32 %v3497_v6 }
 0x780   :  { %v3103_v52 = vpop.eup %3102 }
 0x781   :  { %v3105_v56 = vpop.eup %3104  ;;  %772 = vrot.lane.b32.xlu1 %v3103_v52, %s3291_s0 }
 0x782   :  { %774 = vrot.lane.b32.xlu0 %v3105_v56, %s3291_s0 }
 0x784   :  { %v3107_v7 = vpop.eup %3106 }
 0x785   :  { %639 = vrot.lane.b32.xlu1 %v3107_v7, %s3291_s0 }
 0x7f3   :  { %v773_v15 = vpop.permute.xlu1 %772 }
 0x7f4   :  { %v775_v19 = vpop.permute.xlu0 %774  ;;  %v778_v21 = vmul.f32 %v3097_v43, %v773_v15 }
 0x7f5   :  { %v779_v20 = vmul.f32 %v3099_v46, %v775_v19 }
 0x7f6   :  { %v892_v27 = vrot.slane %v778_v21, 2 }
 0x7f7   :  { %v782_v23 = vrot.slane %v779_v20, 7  ;;  %v640_v25 = vpop.permute.xlu1 %639  ;;  %v893_v26 = vrot.slane %v779_v20, 1 }
 0x7f8   :  { %v642_v28 = vmul.f32 %v3101_v53, %v640_v25 }
 0x7f9   :  { %v784_v29 = vsel %vm783_vm7, %v782_v23, %v778_v21  ;;  %v894_v9 = vsel %vm283_vm4, %v893_v26, %v892_v27 }
 0x7fa   :  { %785 = vrot.lane.b32.xlu0 %v784_v29, %s3292_s8  ;;  %v789_v31 = vrot.slane %v642_v28, 6  ;;  %v2178_v32 = vrot.slane %v642_v28, %v3507_v16 }
 0x7fc   :  { %v2179_v34 = vcombine.high %v2178_v32, %v2178_v32  ;;  %v2186_v35 = vrot.slane %v2178_v32, %v3507_v16  ;;  %790 = vrot.lane.b32.xlu1 %v789_v31, %s3293_s2 }
 0x7fe   :  { %895 = vrot.lane.b32.xlu0 %v894_v9, %s3292_s8  ;;  %v2193_v37 = vrot.slane %v2179_v34, %v3507_v16  ;;  %v2330_v38 = vrot.slane %v2186_v35, %v3513_v30  ;;  %v993_v34 = vrot.slane %v3492_v3, 7 }
 0x800   :  { %v2334_v40 = vrot.slane %v2193_v37, %v3513_v30  ;;  %v3526_v41 = vsel %vm2048_vm8, %v2162_v36, %v2330_v38 }
 0x802   :  { %v3529_v43 = vsel %vm2048_vm8, %v2169_v39, %v2334_v40 }
 0x86c   :  { %v786_v44 = vpop.permute.xlu0 %785 }
 0x86e   :  { %v791_v46 = vpop.permute.xlu1 %790 }
 0x86f   :  { %v793_v47 = vsel %vm144_vm3, %v786_v44, %v791_v46 }
 0x870   :  { %v896_v48 = vpop.permute.xlu0 %895  ;;  %v795_v50 = vrot.slane %v793_v47, 2 }
 0x871   :  { %2746 = vmatmul.mubr.msk.f32.vlgmr.msra.gmra.mrb[4].mxu1 %vm144_vm3, %v896_v48 }
 0x872   :  { %2949 = vmatpush3.bf16.msra.mxu1 %v3381_v49  ;;  %2764 = vmatprep.mubr.msk.f32.mxu1 %vm3289_vm0, %v3290_v1 }
 0x873   :  { %2735 = vmatmul.mubr.msk.f32.vlgmr.msra.gmra.mrb[8].mxu0 %vm297_vm5, %v795_v50  ;;  %2950 = vmatprep.subr.bf16.mxu1 %v3288_v0 }
 0x874   :  { %2961 = vmatpush3.bf16.msra.mxu0 %v3339_v8  ;;  %2775 = vmatprep.mubr.msk.f32.mxu0 %vm3289_vm0, %v3290_v1 }
 0x875   :  { %2962 = vmatprep.subr.bf16.mxu0 %v3288_v0 }
 0x876   :  { %2952 = vmatpush3.bf16.msra.mxu1 %v3384_v51 }
 0x877   :  { %2953 = vmatprep.subr.bf16.mxu1 %v3288_v0 }
 0x878   :  { %2964 = vmatpush3.bf16.msra.mxu0 %v3346_v12 }
 0x879   :  { %2965 = vmatprep.subr.bf16.mxu0 %v3288_v0 }
 0x87a   :  { %2955 = vmatpush3.bf16.msra.mxu1 %v3389_v55 }
 0x87b   :  { %2956 = vmatprep.subr.bf16.mxu1 %v3288_v0 }
 0x87e   :  { %2958 = vmatpush3.bf16.msra.mxu1 %v3397_v60 }
 0x87f   :  { %2977 = vmatprep.subr.bf16.mxu1 %v3288_v0 }
 0x944   :  { %v965_v53 = vpop.f32.mrb[4].mxu1 }
 0x945   :  { %v970_v54 = vrot.slane %v965_v53, 5  ;;  %v971_v57 = vrot.slane %v965_v53, 6  ;;  %v2747_v58 = vpop.f32.mrb[5].mxu1 }
 0x946   :  { %v864_v42 = vpop.f32.mrb[8].mxu0 }
 0x947   :  { %v974_v45 = vadd.f32 %v970_v54, %v3368_v22  ;;  %v975_v61 = vadd.f32 %v971_v57, %v3365_v18  ;;  %v2736_v62 = vpop.f32.mrb[9].mxu0  ;;  %v865_v2 = vadd.f32 %v3426_v17, %v864_v42 }
 0x949   :  { %3108 = vtanh.f32 %v974_v45  ;;  %v2503_v56 = vmul.f32 -1.442695, %v974_v45  ;;  %v2504_v7 = vmul.f32 -1.442695, %v975_v61  ;;  %v2501_v10 = vmul.f32 -1.442695, %v865_v2 }
 0x94a   :  { %3110 = vtanh.f32 %v975_v61 }
 0x94b   :  { %3112 = vtanh.f32 %v865_v2 }
 0x94c   :  { %3114 = vpow2.f32 %v2503_v56 }
 0x94d   :  { %3116 = vpow2.f32 %v2504_v7 }
 0x94e   :  { %3118 = vpow2.f32 %v2501_v10 }
 0x953   :  { %v3109_v4 = vpop.eup %3108 }
 0x954   :  { %v3111_v5 = vpop.eup %3110  ;;  %1000 = vrot.lane.b32.xlu1 %v3109_v4, %s3291_s0 }
 0x955   :  { %1002 = vrot.lane.b32.xlu0 %v3111_v5, %s3291_s0  ;;  %v3113_v52 = vpop.eup %3112 }
 0x956   :  { %v3115_v11 = vpop.eup %3114 }
 0x957   :  { %v3117_v14 = vpop.eup %3116  ;;  %v982_v15 = vadd.f32 1.0, %v3115_v11 }
 0x958   :  { %877 = vrot.lane.b32.xlu1 %v3113_v52, %s3291_s0  ;;  %v983_v19 = vadd.f32 1.0, %v3117_v14  ;;  %v3119_v20 = vpop.eup %3118 }
 0x959   :  { %3120 = vrcp.f32 %v982_v15  ;;  %v871_v21 = vadd.f32 1.0, %v3119_v20 }
 0x95a   :  { %3122 = vrcp.f32 %v983_v19 }
 0x95b   :  { %3124 = vrcp.f32 %v871_v21 }
 0x963   :  { %v3121_v23 = vpop.eup %3120 }
 0x964   :  { %v3123_v25 = vpop.eup %3122  ;;  %v996_v35 = vmul.f32 %v3121_v23, %v992_v33 }
 0x965   :  { %v3125_v29 = vpop.eup %3124  ;;  %v997_v36 = vmul.f32 %v3123_v25, %v993_v34 }
 0x966   :  { %v875_v40 = vmul.f32 %v3125_v29, %v3497_v6 }
 0x9c6   :  { %v1001_v24 = vpop.permute.xlu1 %1000 }
 0x9c7   :  { %v1003_v26 = vpop.permute.xlu0 %1002  ;;  %v1006_v27 = vmul.f32 %v3121_v23, %v1001_v24 }
 0x9c8   :  { %v1007_v28 = vmul.f32 %v3123_v25, %v1003_v26 }
 0x9c9   :  { %1010 = vrot.lane.b32.xlu0 %v1006_v27, %s3291_s0 }
 0x9ca   :  { %1012 = vrot.lane.b32.xlu1 %v1007_v28, %s3291_s0  ;;  %v878_v31 = vpop.permute.xlu1 %877 }
 0x9cb   :  { %v880_v32 = vmul.f32 %v3125_v29, %v878_v31 }
 0x9cd   :  { %882 = vrot.lane.b32.xlu0 %v880_v32, %s3291_s0 }
 0xa3b   :  { %v1011_v9 = vpop.permute.xlu0 %1010 }
 0xa3c   :  { %v3561_v37 = vadd.f32 %v1011_v9, %v996_v35  ;;  %v1013_v38 = vpop.permute.xlu1 %1012 }
 0xa3d   :  { %v3563_v39 = vadd.f32 %v1013_v38, %v997_v36 }
 0xa3e   :  { %3126 = vtanh.f32 %v3561_v37 }
 0xa3f   :  { %3128 = vtanh.f32 %v3563_v39  ;;  %v883_v44 = vpop.permute.xlu0 %882 }
 0xa40   :  { %v3568_v46 = vadd.f32 %v883_v44, %v875_v40 }
 0xa42   :  { %3130 = vtanh.f32 %v3568_v46 }
 0xa48   :  { %v3127_v63 = vpop.eup %3126 }
 0xa49   :  { %v3129_v3 = vpop.eup %3128  ;;  %1022 = vrot.lane.b32.xlu1 %v3127_v63, %s3291_s0 }
 0xa4a   :  { %1024 = vrot.lane.b32.xlu0 %v3129_v3, %s3291_s0 }
 0xa4c   :  { %v3131_v47 = vpop.eup %3130 }
 0xa4d   :  { %888 = vrot.lane.b32.xlu1 %v3131_v47, %s3291_s0 }
 0xabb   :  { %v1023_v48 = vpop.permute.xlu1 %1022 }
 0xabc   :  { %v1025_v50 = vpop.permute.xlu0 %1024  ;;  %v1028_v54 = vmul.f32 %v3121_v23, %v1023_v48 }
 0xabd   :  { %v1029_v53 = vmul.f32 %v3123_v25, %v1025_v50 }
 0xabe   :  { %v1142_v42 = vrot.slane %v1028_v54, 3 }
 0xabf   :  { %v1032_v6 = vrot.slane %v1029_v53, 7  ;;  %v889_v57 = vpop.permute.xlu1 %888  ;;  %v1143_v58 = vrot.slane %v1029_v53, 2 }
 0xac0   :  { %v891_v45 = vmul.f32 %v3125_v29, %v889_v57 }
 0xac1   :  { %v1034_v61 = vsel %vm1033_vm9, %v1032_v6, %v1028_v54  ;;  %v1144_v52 = vsel %vm283_vm4, %v1143_v58, %v1142_v42 }
 0xac2   :  { %1035 = vrot.lane.b32.xlu0 %v1034_v61, %s3292_s8  ;;  %v1039_v62 = vrot.slane %v891_v45, 5  ;;  %v2200_v2 = vrot.slane %v891_v45, %v3507_v16  ;;  %v1242_v61 = vrot.slane %v3561_v37, 7 }
 0xac4   :  { %v2201_v4 = vcombine.high %v2200_v2, %v2200_v2  ;;  %v2208_v5 = vrot.slane %v2200_v2, %v3507_v16  ;;  %1040 = vrot.lane.b32.xlu1 %v1039_v62, %s3293_s2  ;;  %v1243_v62 = vrot.slane %v3563_v39, 7 }
 0xac6   :  { %1145 = vrot.lane.b32.xlu0 %v1144_v52, %s3292_s8  ;;  %v2215_v56 = vrot.slane %v2201_v4, %v3507_v16  ;;  %v2340_v7 = vrot.slane %v2208_v5, %v3513_v30 }
 0xac8   :  { %v2344_v10 = vrot.slane %v2215_v56, %v3513_v30  ;;  %v3584_v11 = vsel %vm2399_vm10, %v3526_v41, %v2340_v7 }
 0xaca   :  { %v3587_v14 = vsel %vm2399_vm10, %v3529_v43, %v2344_v10 }
 0xb34   :  { %v1036_v15 = vpop.permute.xlu0 %1035 }
 0xb36   :  { %v1041_v19 = vpop.permute.xlu1 %1040 }
 0xb37   :  { %v1043_v20 = vsel %vm144_vm3, %v1036_v15, %v1041_v19 }
 0xb38   :  { %v1146_v21 = vpop.permute.xlu0 %1145  ;;  %v1045_v23 = vrot.slane %v1043_v20, 3 }
 0xb39   :  { %2776 = vmatmul.mubr.msk.f32.vlgmr.msra.gmra.mrb[10].mxu0 %vm144_vm3, %v1146_v21 }
 0xb3a   :  { %2967 = vmatpush3.bf16.msra.mxu0 %v3381_v49  ;;  %2794 = vmatprep.mubr.msk.f32.mxu0 %vm3289_vm0, %v3290_v1 }
 0xb3b   :  { %2765 = vmatmul.mubr.msk.f32.vlgmr.msra.gmra.mrb[6].mxu1 %vm297_vm5, %v1045_v23  ;;  %2968 = vmatprep.subr.bf16.mxu0 %v3288_v0 }
 0xb3c   :  { %2979 = vmatpush3.bf16.msra.mxu1 %v3339_v8  ;;  %2805 = vmatprep.mubr.msk.f32.mxu1 %vm3289_vm0, %v3290_v1 }
 0xb3d   :  { %2980 = vmatprep.subr.bf16.mxu1 %v3288_v0 }
 0xb3e   :  { %2970 = vmatpush3.bf16.msra.mxu0 %v3384_v51 }
 0xb3f   :  { %2971 = vmatprep.subr.bf16.mxu0 %v3288_v0 }
 0xb40   :  { %2982 = vmatpush3.bf16.msra.mxu1 %v3346_v12 }
 0xb41   :  { %2983 = vmatprep.subr.bf16.mxu1 %v3288_v0 }
 0xb42   :  { %2973 = vmatpush3.bf16.msra.mxu0 %v3389_v55 }
 0xb43   :  { %2974 = vmatprep.subr.bf16.mxu0 %v3288_v0 }
 0xb46   :  { %2976 = vmatpush3.bf16.msra.mxu0 %v3397_v60 }
 0xb47   :  { %2995 = vmatprep.subr.bf16.mxu0 %v3288_v0 }
 0xc0c   :  { %v1215_v41 = vpop.f32.mrb[10].mxu0 }
 0xc0d   :  { %v1220_v43 = vrot.slane %v1215_v41, 4  ;;  %v1221_v24 = vrot.slane %v1215_v41, 5  ;;  %v2777_v25 = vpop.f32.mrb[11].mxu0 }
 0xc0e   :  { %v1114_v26 = vpop.f32.mrb[6].mxu1 }
 0xc0f   :  { %v1224_v27 = vadd.f32 %v1220_v43, %v3368_v22  ;;  %v1225_v28 = vadd.f32 %v1221_v24, %v3365_v18  ;;  %v2766_v29 = vpop.f32.mrb[7].mxu1  ;;  %v1115_v31 = vadd.f32 %v3426_v17, %v1114_v26 }
 0xc11   :  { %3132 = vtanh.f32 %v1224_v27  ;;  %v2508_v35 = vmul.f32 -1.442695, %v1224_v27  ;;  %v2509_v9 = vmul.f32 -1.442695, %v1225_v28  ;;  %v2506_v36 = vmul.f32 -1.442695, %v1115_v31 }
 0xc12   :  { %3134 = vtanh.f32 %v1225_v28 }
 0xc13   :  { %3136 = vtanh.f32 %v1115_v31 }
 0xc14   :  { %3138 = vpow2.f32 %v2508_v35 }
 0xc15   :  { %3140 = vpow2.f32 %v2509_v9 }
 0xc16   :  { %3142 = vpow2.f32 %v2506_v36 }
 0xc1b   :  { %v3133_v32 = vpop.eup %3132 }
 0xc1c   :  { %v3135_v33 = vpop.eup %3134  ;;  %1250 = vrot.lane.b32.xlu1 %v3133_v32, %s3291_s0 }
 0xc1d   :  { %1252 = vrot.lane.b32.xlu0 %v3135_v33, %s3291_s0  ;;  %v3137_v34 = vpop.eup %3136 }
 0xc1e   :  { %v3139_v38 = vpop.eup %3138 }
 0xc1f   :  { %v3141_v40 = vpop.eup %3140  ;;  %v1232_v44 = vadd.f32 1.0, %v3139_v38 }
 0xc20   :  { %1127 = vrot.lane.b32.xlu1 %v3137_v34, %s3291_s0  ;;  %v1233_v63 = vadd.f32 1.0, %v3141_v40  ;;  %v3143_v3 = vpop.eup %3142 }
 0xc21   :  { %3144 = vrcp.f32 %v1232_v44  ;;  %v1121_v47 = vadd.f32 1.0, %v3143_v3 }
 0xc22   :  { %3146 = vrcp.f32 %v1233_v63 }
 0xc23   :  { %3148 = vrcp.f32 %v1121_v47 }
 0xc2b   :  { %v3145_v48 = vpop.eup %3144 }
 0xc2c   :  { %v3147_v53 = vpop.eup %3146  ;;  %v1246_v2 = vmul.f32 %v3145_v48, %v1242_v61 }
 0xc2d   :  { %v3149_v58 = vpop.eup %3148  ;;  %v1247_v5 = vmul.f32 %v3147_v53, %v1243_v62 }
 0xc2e   :  { %v1125_v10 = vmul.f32 %v3149_v58, %v3568_v46 }
 0xc8e   :  { %v1251_v50 = vpop.permute.xlu1 %1250 }
 0xc8f   :  { %v1253_v54 = vpop.permute.xlu0 %1252  ;;  %v1256_v6 = vmul.f32 %v3145_v48, %v1251_v50 }
 0xc90   :  { %v1257_v57 = vmul.f32 %v3147_v53, %v1253_v54 }
 0xc91   :  { %1260 = vrot.lane.b32.xlu0 %v1256_v6, %s3291_s0 }
 0xc92   :  { %1262 = vrot.lane.b32.xlu1 %v1257_v57, %s3291_s0  ;;  %v1128_v42 = vpop.permute.xlu1 %1127 }
 0xc93   :  { %v1130_v45 = vmul.f32 %v3149_v58, %v1128_v42 }
 0xc95   :  { %1132 = vrot.lane.b32.xlu0 %v1130_v45, %s3291_s0 }
 0xd03   :  { %v1261_v4 = vpop.permute.xlu0 %1260 }
 0xd04   :  { %v3619_v52 = vadd.f32 %v1261_v4, %v1246_v2  ;;  %v1263_v56 = vpop.permute.xlu1 %1262 }
 0xd05   :  { %v3621_v7 = vadd.f32 %v1263_v56, %v1247_v5 }
 0xd06   :  { %3150 = vtanh.f32 %v3619_v52 }
 0xd07   :  { %3152 = vtanh.f32 %v3621_v7  ;;  %v1133_v15 = vpop.permute.xlu0 %1132 }
 0xd08   :  { %v3626_v19 = vadd.f32 %v1133_v15, %v1125_v10 }
 0xd0a   :  { %3154 = vtanh.f32 %v3626_v19 }
 0xd10   :  { %v3151_v37 = vpop.eup %3150 }
 0xd11   :  { %v3153_v39 = vpop.eup %3152  ;;  %1272 = vrot.lane.b32.xlu1 %v3151_v37, %s3291_s0 }
 0xd12   :  { %1274 = vrot.lane.b32.xlu0 %v3153_v39, %s3291_s0 }
 0xd14   :  { %v3155_v20 = vpop.eup %3154 }
 0xd15   :  { %1138 = vrot.lane.b32.xlu1 %v3155_v20, %s3291_s0 }
 0xd83   :  { %v1273_v21 = vpop.permute.xlu1 %1272 }
 0xd84   :  { %v1275_v23 = vpop.permute.xlu0 %1274  ;;  %v1278_v43 = vmul.f32 %v3145_v48, %v1273_v21 }
 0xd85   :  { %v1279_v41 = vmul.f32 %v3147_v53, %v1275_v23 }
 0xd86   :  { %v1392_v26 = vrot.slane %v1278_v43, 4 }
 0xd87   :  { %v1282_v46 = vrot.slane %v1279_v41, 7  ;;  %v1139_v24 = vpop.permute.xlu1 %1138  ;;  %v1393_v25 = vrot.slane %v1279_v41, 3 }
 0xd88   :  { %v1141_v27 = vmul.f32 %v3149_v58, %v1139_v24 }
 0xd89   :  { %v1284_v28 = vsel %vm1283_vm11, %v1282_v46, %v1278_v43  ;;  %v1394_v34 = vsel %vm283_vm4, %v1393_v25, %v1392_v26 }
 0xd8a   :  { %1285 = vrot.lane.b32.xlu0 %v1284_v28, %s3292_s8  ;;  %v1289_v29 = vrot.slane %v1141_v27, 4  ;;  %v2222_v31 = vrot.slane %v1141_v27, %v3507_v16  ;;  %v1492_v27 = vrot.slane %v3619_v52, 7  ;;  %v1493_v28 = vrot.slane %v3621_v7, 7 }
 0xd8c   :  { %v2223_v32 = vcombine.high %v2222_v31, %v2222_v31  ;;  %v2230_v33 = vrot.slane %v2222_v31, %v3507_v16  ;;  %1290 = vrot.lane.b32.xlu1 %v1289_v29, %s3293_s2 }
 0xd8e   :  { %1395 = vrot.lane.b32.xlu0 %v1394_v34, %s3292_s8  ;;  %v2237_v35 = vrot.slane %v2223_v32, %v3507_v16  ;;  %v2350_v9 = vrot.slane %v2230_v33, %v3513_v30 }
 0xd90   :  { %v2354_v36 = vrot.slane %v2237_v35, %v3513_v30  ;;  %v3642_v38 = vsel %vm2402_vm12, %v3584_v11, %v2350_v9 }
 0xd92   :  { %v3645_v40 = vsel %vm2402_vm12, %v3587_v14, %v2354_v36 }
 0xdfc   :  { %v1286_v44 = vpop.permute.xlu0 %1285 }
 0xdfe   :  { %v1291_v63 = vpop.permute.xlu1 %1290 }
 0xdff   :  { %v1293_v3 = vsel %vm144_vm3, %v1286_v44, %v1291_v63 }
 0xe00   :  { %v1396_v47 = vpop.permute.xlu0 %1395  ;;  %v1295_v48 = vrot.slane %v1293_v3, 4 }
 0xe01   :  { %2806 = vmatmul.mubr.msk.f32.vlgmr.msra.gmra.mrb[8].mxu1 %vm144_vm3, %v1396_v47 }
 0xe02   :  { %2985 = vmatpush3.bf16.msra.mxu1 %v3381_v49  ;;  %2824 = vmatprep.mubr.msk.f32.mxu1 %vm3289_vm0, %v3290_v1 }
 0xe03   :  { %2795 = vmatmul.mubr.msk.f32.vlgmr.msra.gmra.mrb[12].mxu0 %vm297_vm5, %v1295_v48  ;;  %2986 = vmatprep.subr.bf16.mxu1 %v3288_v0 }
 0xe04   :  { %2997 = vmatpush3.bf16.msra.mxu0 %v3339_v8  ;;  %2835 = vmatprep.mubr.msk.f32.mxu0 %vm3289_vm0, %v3290_v1 }
 0xe05   :  { %2998 = vmatprep.subr.bf16.mxu0 %v3288_v0 }
 0xe06   :  { %2988 = vmatpush3.bf16.msra.mxu1 %v3384_v51 }
 0xe07   :  { %2989 = vmatprep.subr.bf16.mxu1 %v3288_v0 }
 0xe08   :  { %3000 = vmatpush3.bf16.msra.mxu0 %v3346_v12 }
 0xe09   :  { %3001 = vmatprep.subr.bf16.mxu0 %v3288_v0 }
 0xe0a   :  { %2991 = vmatpush3.bf16.msra.mxu1 %v3389_v55 }
 0xe0b   :  { %2992 = vmatprep.subr.bf16.mxu1 %v3288_v0 }
 0xe0e   :  { %2994 = vmatpush3.bf16.msra.mxu1 %v3397_v60 }
 0xe0f   :  { %3013 = vmatprep.subr.bf16.mxu1 %v3288_v0 }
 0xed4   :  { %v1465_v11 = vpop.f32.mrb[8].mxu1 }
 0xed5   :  { %v1470_v14 = vrot.slane %v1465_v11, 3  ;;  %v1471_v50 = vrot.slane %v1465_v11, 4  ;;  %v2807_v53 = vpop.f32.mrb[9].mxu1 }
 0xed6   :  { %v1364_v54 = vpop.f32.mrb[12].mxu0 }
 0xed7   :  { %v1474_v6 = vadd.f32 %v1470_v14, %v3368_v22  ;;  %v1475_v57 = vadd.f32 %v1471_v50, %v3365_v18  ;;  %v2796_v58 = vpop.f32.mrb[13].mxu0  ;;  %v1365_v42 = vadd.f32 %v3426_v17, %v1364_v54 }
 0xed9   :  { %3156 = vtanh.f32 %v1474_v6  ;;  %v2513_v2 = vmul.f32 -1.442695, %v1474_v6  ;;  %v2514_v4 = vmul.f32 -1.442695, %v1475_v57  ;;  %v2511_v5 = vmul.f32 -1.442695, %v1365_v42 }
 0xeda   :  { %3158 = vtanh.f32 %v1475_v57 }
 0xedb   :  { %3160 = vtanh.f32 %v1365_v42 }
 0xedc   :  { %3162 = vpow2.f32 %v2513_v2 }
 0xedd   :  { %3164 = vpow2.f32 %v2514_v4 }
 0xede   :  { %3166 = vpow2.f32 %v2511_v5 }
 0xee3   :  { %v3157_v45 = vpop.eup %3156 }
 0xee4   :  { %v3159_v61 = vpop.eup %3158  ;;  %1500 = vrot.lane.b32.xlu1 %v3157_v45, %s3291_s0 }
 0xee5   :  { %1502 = vrot.lane.b32.xlu0 %v3159_v61, %s3291_s0  ;;  %v3161_v62 = vpop.eup %3160 }
 0xee6   :  { %v3163_v56 = vpop.eup %3162 }
 0xee7   :  { %v3165_v10 = vpop.eup %3164  ;;  %v1482_v15 = vadd.f32 1.0, %v3163_v56 }
 0xee8   :  { %1377 = vrot.lane.b32.xlu1 %v3161_v62, %s3291_s0  ;;  %v1483_v17 = vadd.f32 1.0, %v3165_v10  ;;  %v3167_v37 = vpop.eup %3166 }
 0xee9   :  { %3168 = vrcp.f32 %v1482_v15  ;;  %v1371_v39 = vadd.f32 1.0, %v3167_v37 }
 0xeea   :  { %3170 = vrcp.f32 %v1483_v17 }
 0xeeb   :  { %3172 = vrcp.f32 %v1371_v39 }
 0xef3   :  { %v3169_v20 = vpop.eup %3168 }
 0xef4   :  { %v3171_v23 = vpop.eup %3170  ;;  %v1496_v29 = vmul.f32 %v3169_v20, %v1492_v27 }
 0xef5   :  { %v3173_v24 = vpop.eup %3172  ;;  %v1497_v32 = vmul.f32 %v3171_v23, %v1493_v28 }
 0xef6   :  { %v1375_v9 = vmul.f32 %v3173_v24, %v3626_v19 }
 0xf56   :  { %v1501_v21 = vpop.permute.xlu1 %1500 }
 0xf57   :  { %v1503_v41 = vpop.permute.xlu0 %1502  ;;  %v1506_v43 = vmul.f32 %v3169_v20, %v1501_v21 }
 0xf58   :  { %v1507_v46 = vmul.f32 %v3171_v23, %v1503_v41 }
 0xf59   :  { %1510 = vrot.lane.b32.xlu0 %v1506_v43, %s3291_s0 }
 0xf5a   :  { %1512 = vrot.lane.b32.xlu1 %v1507_v46, %s3291_s0  ;;  %v1378_v25 = vpop.permute.xlu1 %1377 }
 0xf5b   :  { %v1380_v26 = vmul.f32 %v3173_v24, %v1378_v25 }
 0xf5d   :  { %1382 = vrot.lane.b32.xlu0 %v1380_v26, %s3291_s0 }
 0xfcb   :  { %v1511_v31 = vpop.permute.xlu0 %1510 }
 0xfcc   :  { %v3677_v33 = vadd.f32 %v1511_v31, %v1496_v29  ;;  %v1513_v34 = vpop.permute.xlu1 %1512 }
 0xfcd   :  { %v3679_v35 = vadd.f32 %v1513_v34, %v1497_v32 }
 0xfce   :  { %3174 = vtanh.f32 %v3677_v33 }
 0xfcf   :  { %3176 = vtanh.f32 %v3679_v35  ;;  %v1383_v36 = vpop.permute.xlu0 %1382 }
 0xfd0   :  { %v3684_v44 = vadd.f32 %v1383_v36, %v1375_v9 }
 0xfd2   :  { %3178 = vtanh.f32 %v3684_v44 }
 0xfd8   :  { %v3175_v52 = vpop.eup %3174 }
 0xfd9   :  { %v3177_v7 = vpop.eup %3176  ;;  %1522 = vrot.lane.b32.xlu1 %v3175_v52, %s3291_s0 }
 0xfda   :  { %1524 = vrot.lane.b32.xlu0 %v3177_v7, %s3291_s0 }
 0xfdc   :  { %v3179_v63 = vpop.eup %3178 }
 0xfdd   :  { %1388 = vrot.lane.b32.xlu1 %v3179_v63, %s3291_s0 }
0x104b   :  { %v1523_v3 = vpop.permute.xlu1 %1522 }
0x104c   :  { %v1525_v47 = vpop.permute.xlu0 %1524  ;;  %v1528_v11 = vmul.f32 %v3169_v20, %v1523_v3 }
0x104d   :  { %v1529_v48 = vmul.f32 %v3171_v23, %v1525_v47 }
0x104e   :  { %v1642_v53 = vrot.slane %v1528_v11, 5 }
0x104f   :  { %v1532_v19 = vrot.slane %v1529_v48, 7  ;;  %v1389_v14 = vpop.permute.xlu1 %1388  ;;  %v1643_v50 = vrot.slane %v1529_v48, 4 }
0x1050   :  { %v1391_v54 = vmul.f32 %v3173_v24, %v1389_v14 }
0x1051   :  { %v1534_v6 = vsel %vm1533_vm13, %v1532_v19, %v1528_v11  ;;  %v1644_v61 = vsel %vm283_vm4, %v1643_v50, %v1642_v53  ;;  %v1743_v53 = vrot.slane %v3679_v35, 7 }
0x1052   :  { %1535 = vrot.lane.b32.xlu0 %v1534_v6, %s3292_s8  ;;  %v1539_v57 = vrot.slane %v1391_v54, 3  ;;  %v2244_v58 = vrot.slane %v1391_v54, %v3507_v16 }
0x1054   :  { %v2245_v42 = vcombine.high %v2244_v58, %v2244_v58  ;;  %v2252_v45 = vrot.slane %v2244_v58, %v3507_v16  ;;  %1540 = vrot.lane.b32.xlu1 %v1539_v57, %s3293_s2  ;;  %v1742_v57 = vrot.slane %v3677_v33, 7 }
0x1056   :  { %1645 = vrot.lane.b32.xlu0 %v1644_v61, %s3292_s8  ;;  %v2259_v62 = vrot.slane %v2245_v42, %v3507_v16  ;;  %v2360_v2 = vrot.slane %v2252_v45, %v3513_v30 }
0x1058   :  { %v2364_v4 = vrot.slane %v2259_v62, %v3513_v30  ;;  %v3701_v5 = vsel %vm58_vm1, %v3642_v38, %v2360_v2 }
0x105a   :  { %v3705_v56 = vsel %vm58_vm1, %v3645_v40, %v2364_v4  ;;  %vm2413_vm1 = vcmask 1046528  }
0x10c4   :  { %v1536_v10 = vpop.permute.xlu0 %1535 }
0x10c6   :  { %v1541_v15 = vpop.permute.xlu1 %1540 }
0x10c7   :  { %v1543_v17 = vsel %vm144_vm3, %v1536_v10, %v1541_v15 }
0x10c8   :  { %v1646_v37 = vpop.permute.xlu0 %1645  ;;  %v1545_v39 = vrot.slane %v1543_v17, 5 }
0x10c9   :  { %2836 = vmatmul.mubr.msk.f32.vlgmr.msra.gmra.mrb[14].mxu0 %vm144_vm3, %v1646_v37 }
0x10ca   :  { %3003 = vmatpush3.bf16.msra.mxu0 %v3381_v49  ;;  %2854 = vmatprep.mubr.msk.f32.mxu0 %vm3289_vm0, %v3290_v1 }
0x10cb   :  { %2825 = vmatmul.mubr.msk.f32.vlgmr.msra.gmra.mrb[10].mxu1 %vm297_vm5, %v1545_v39  ;;  %3004 = vmatprep.subr.bf16.mxu0 %v3288_v0 }
0x10cc   :  { %3015 = vmatpush3.bf16.msra.mxu1 %v3339_v8  ;;  %2865 = vmatprep.mubr.msk.f32.mxu1 %vm3289_vm0, %v3290_v1 }
0x10cd   :  { %3016 = vmatprep.subr.bf16.mxu1 %v3288_v0 }
0x10ce   :  { %3006 = vmatpush3.bf16.msra.mxu0 %v3384_v51 }
0x10cf   :  { %3007 = vmatprep.subr.bf16.mxu0 %v3288_v0 }
0x10d0   :  { %3018 = vmatpush3.bf16.msra.mxu1 %v3346_v12  ;;  %v3727_v12 = vld [vmem:[#allocation2 + $0x70] ss:$0 sm:$0xff] }
0x10d1   :  { %3019 = vmatprep.subr.bf16.mxu1 %v3288_v0 }
0x10d2   :  { %3009 = vmatpush3.bf16.msra.mxu0 %v3389_v55 }
0x10d3   :  { %3010 = vmatprep.subr.bf16.mxu0 %v3288_v0 }
0x10d6   :  { %3012 = vmatpush3.bf16.msra.mxu0 %v3397_v60 }
0x119c   :  { %v1715_v8 = vpop.f32.mrb[14].mxu0 }
0x119d   :  { %v1720_v38 = vrot.slane %v1715_v8, 2  ;;  %v1721_v40 = vrot.slane %v1715_v8, 3  ;;  %v2837_v20 = vpop.f32.mrb[15].mxu0 }
0x119e   :  { %v1614_v21 = vpop.f32.mrb[10].mxu1 }
0x119f   :  { %v1725_v23 = vadd.f32 %v1721_v40, %v3365_v18  ;;  %v2826_v41 = vpop.f32.mrb[11].mxu1  ;;  %v1724_v43 = vadd.f32 %v1720_v38, %v3368_v22  ;;  %v1615_v46 = vadd.f32 %v3727_v12, %v1614_v21 }
0x11a1   :  { %3180 = vtanh.f32 %v1725_v23  ;;  %v2519_v27 = vmul.f32 -1.442695, %v1725_v23  ;;  %v2518_v28 = vmul.f32 -1.442695, %v1724_v43  ;;  %v2516_v29 = vmul.f32 -1.442695, %v1615_v46 }
0x11a2   :  { %3182 = vtanh.f32 %v1724_v43 }
0x11a3   :  { %3184 = vtanh.f32 %v1615_v46 }
0x11a4   :  { %3186 = vpow2.f32 %v2519_v27 }
0x11a5   :  { %3188 = vpow2.f32 %v2518_v28 }
0x11a6   :  { %3190 = vpow2.f32 %v2516_v29 }
0x11ab   :  { %v3181_v24 = vpop.eup %3180 }
0x11ac   :  { %1752 = vrot.lane.b32.xlu1 %v3181_v24, %s3291_s0  ;;  %v3183_v25 = vpop.eup %3182 }
0x11ad   :  { %v3185_v26 = vpop.eup %3184 }
0x11ae   :  { %1627 = vrot.lane.b32.xlu0 %v3185_v26, %s3291_s0  ;;  %v3187_v31 = vpop.eup %3186 }
0x11af   :  { %v3189_v32 = vpop.eup %3188  ;;  %v1733_v34 = vadd.f32 1.0, %v3187_v31 }
0x11b0   :  { %1750 = vrot.lane.b32.xlu1 %v3183_v25, %s3291_s0  ;;  %v3191_v9 = vpop.eup %3190  ;;  %v1732_v36 = vadd.f32 1.0, %v3189_v32 }
0x11b1   :  { %3192 = vrcp.f32 %v1733_v34  ;;  %v1621_v52 = vadd.f32 1.0, %v3191_v9 }
0x11b2   :  { %3194 = vrcp.f32 %v1732_v36 }
0x11b3   :  { %3196 = vrcp.f32 %v1621_v52 }
0x11bb   :  { %v3193_v7 = vpop.eup %3192 }
0x11bc   :  { %v3195_v47 = vpop.eup %3194  ;;  %v1747_v54 = vmul.f32 %v3193_v7, %v1743_v53 }
0x11bd   :  { %v3197_v48 = vpop.eup %3196  ;;  %v1746_v45 = vmul.f32 %v3195_v47, %v1742_v57 }
0x11be   :  { %v1625_v42 = vmul.f32 %v3197_v48, %v3684_v44 }
0x121e   :  { %v1753_v63 = vpop.permute.xlu1 %1752 }
0x121f   :  { %v1757_v3 = vmul.f32 %v3193_v7, %v1753_v63 }
0x1220   :  { %v1628_v11 = vpop.permute.xlu0 %1627 }
0x1221   :  { %1762 = vrot.lane.b32.xlu0 %v1757_v3, %s3291_s0  ;;  %v1630_v14 = vmul.f32 %v3197_v48, %v1628_v11 }
0x1222   :  { %v1751_v19 = vpop.permute.xlu1 %1750 }
0x1223   :  { %v1756_v50 = vmul.f32 %v3195_v47, %v1751_v19  ;;  %1632 = vrot.lane.b32.xlu1 %v1630_v14, %s3291_s0 }
0x1225   :  { %1760 = vrot.lane.b32.xlu0 %v1756_v50, %s3291_s0 }
0x1293   :  { %v1763_v6 = vpop.permute.xlu0 %1762 }
0x1294   :  { %v3738_v58 = vadd.f32 %v1763_v6, %v1747_v54 }
0x1295   :  { %v1633_v61 = vpop.permute.xlu1 %1632 }
0x1296   :  { %3198 = vtanh.f32 %v3738_v58  ;;  %v3742_v2 = vadd.f32 %v1633_v61, %v1625_v42 }
0x1297   :  { %v1761_v62 = vpop.permute.xlu0 %1760 }
0x1298   :  { %v3744_v4 = vadd.f32 %v1761_v62, %v1746_v45  ;;  %3200 = vtanh.f32 %v3742_v2 }
0x129a   :  { %3202 = vtanh.f32 %v3744_v4 }
0x12a0   :  { %v3199_v35 = vpop.eup %3198 }
0x12a1   :  { %1774 = vrot.lane.b32.xlu1 %v3199_v35, %s3291_s0 }
0x12a2   :  { %v3201_v33 = vpop.eup %3200 }
0x12a3   :  { %1638 = vrot.lane.b32.xlu0 %v3201_v33, %s3291_s0 }
0x12a4   :  { %v3203_v10 = vpop.eup %3202 }
0x12a5   :  { %1772 = vrot.lane.b32.xlu1 %v3203_v10, %s3291_s0 }
0x1313   :  { %v1775_v44 = vpop.permute.xlu1 %1774 }
0x1314   :  { %v1779_v15 = vmul.f32 %v3193_v7, %v1775_v44 }
0x1315   :  { %v1639_v17 = vpop.permute.xlu0 %1638 }
0x1316   :  { %v1641_v37 = vmul.f32 %v3197_v48, %v1639_v17  ;;  %v1782_v8 = vrot.slane %v1779_v15, 7  ;;  %v1893_v46 = vrot.slane %v1779_v15, 5  ;;  %v1993_v15 = vrot.slane %v3738_v58, 7 }
0x1317   :  { %v1773_v39 = vpop.permute.xlu1 %1772  ;;  %v1992_v17 = vrot.slane %v3744_v4, 7 }
0x1318   :  { %v1778_v38 = vmul.f32 %v3195_v47, %v1773_v39  ;;  %v1789_v40 = vrot.slane %v1641_v37, 2  ;;  %v2266_v20 = vrot.slane %v1641_v37, %v3507_v16 }
0x131a   :  { %v1892_v21 = vrot.slane %v1778_v38, 6  ;;  %v1784_v23 = vsel %vm1783_vm14, %v1782_v8, %v1778_v38  ;;  %v2267_v41 = vcombine.high %v2266_v20, %v2266_v20  ;;  %v2274_v43 = vrot.slane %v2266_v20, %v3507_v16  ;;  %1790 = vrot.lane.b32.xlu1 %v1789_v40, %s3293_s2 }
0x131b   :  { %1785 = vrot.lane.b32.xlu0 %v1784_v23, %s3292_s8 }
0x131c   :  { %v2281_v24 = vrot.slane %v2267_v41, %v3507_v16  ;;  %v2370_v25 = vrot.slane %v2274_v43, %v3513_v30  ;;  %v1894_v26 = vsel %vm283_vm4, %v1893_v46, %v1892_v21 }
0x131e   :  { %v2374_v27 = vrot.slane %v2281_v24, %v3513_v30  ;;  %v3761_v28 = vsel %vm2407_vm15, %v3701_v5, %v2370_v25 }
0x131f   :  { %1895 = vrot.lane.b32.xlu0 %v1894_v26, %s3292_s8 }
0x1320   :  { %v3764_v29 = vsel %vm2407_vm15, %v3705_v56, %v2374_v27 }
0x138c   :  { %v1791_v31 = vpop.permute.xlu1 %1790 }
0x138d   :  { %v1786_v32 = vpop.permute.xlu0 %1785 }
0x138e   :  { %v1793_v34 = vsel %vm144_vm3, %v1786_v32, %v1791_v31 }
0x138f   :  { %v1795_v9 = vrot.slane %v1793_v34, 6 }
0x1391   :  { %v1896_v36 = vpop.permute.xlu0 %1895  ;;  %2855 = vmatmul.mubr.msk.f32.vlgmr.msra.gmra.mrb[16].mxu0 %vm297_vm5, %v1795_v9 }
0x1392   :  { %2866 = vmatmul.mubr.msk.f32.vlgmr.msra.gmra.mrb[12].mxu1 %vm144_vm3, %v1896_v36 }
0x1393   :  { %3021 = vmatpush3.bf16.msra.mxu1 %v3381_v49  ;;  %2884 = vmatprep.mubr.msk.f32.mxu1 %vm3289_vm0, %v3290_v1  ;;  %vm2410_vm0 = vcmask 1045504  }
0x1394   :  { %3022 = vmatprep.subr.bf16.mxu1 %v3288_v0 }
0x1397   :  { %3024 = vmatpush3.bf16.msra.mxu1 %v3384_v51 }
0x1398   :  { %3025 = vmatprep.subr.bf16.mxu1 %v3288_v0 }
0x139b   :  { %3027 = vmatpush3.bf16.msra.mxu1 %v3389_v55 }
0x139c   :  { %3028 = vmatprep.subr.bf16.mxu1 %v3288_v0 }
0x139f   :  { %3030 = vmatpush3.bf16.msra.mxu1 %v3397_v60 }
0x1464   :  { %v1864_v5 = vpop.f32.mrb[16].mxu0 }
0x1465   :  { %v1865_v56 = vadd.f32 %v3727_v12, %v1864_v5  ;;  %v2856_v52 = vpop.f32.mrb[17].mxu0  ;;  %v1965_v49 = vpop.f32.mrb[12].mxu1 }
0x1466   :  { %v1970_v7 = vrot.slane %v1965_v49, 1  ;;  %v1971_v63 = vrot.slane %v1965_v49, 2  ;;  %v2867_v1 = vpop.f32.mrb[13].mxu1 }
0x1467   :  { %3204 = vtanh.f32 %v1865_v56  ;;  %v2521_v47 = vmul.f32 -1.442695, %v1865_v56 }
0x1468   :  { %v1974_v3 = vadd.f32 %v1970_v7, %v3368_v22  ;;  %v1975_v51 = vadd.f32 %v1971_v63, %v3365_v18 }
0x146a   :  { %3206 = vtanh.f32 %v1974_v3  ;;  %v2523_v48 = vmul.f32 -1.442695, %v1974_v3  ;;  %v2524_v11 = vmul.f32 -1.442695, %v1975_v51 }
0x146b   :  { %3208 = vtanh.f32 %v1975_v51 }
0x146c   :  { %3210 = vpow2.f32 %v2521_v47 }
0x146d   :  { %3212 = vpow2.f32 %v2523_v48 }
0x146e   :  { %3214 = vpow2.f32 %v2524_v11 }
0x1471   :  { %v3205_v55 = vpop.eup %3204 }
0x1472   :  { %1877 = vrot.lane.b32.xlu1 %v3205_v55, %s3291_s0 }
0x1474   :  { %v3207_v0 = vpop.eup %3206 }
0x1475   :  { %v3209_v60 = vpop.eup %3208 }
0x1476   :  { %2002 = vrot.lane.b32.xlu0 %v3209_v60, %s3291_s0  ;;  %2000 = vrot.lane.b32.xlu1 %v3207_v0, %s3291_s0  ;;  %v3211_v22 = vpop.eup %3210 }
0x1477   :  { %v3213_v19 = vpop.eup %3212  ;;  %v1871_v18 = vadd.f32 1.0, %v3211_v22 }
0x1478   :  { %v3215_v14 = vpop.eup %3214  ;;  %v1982_v50 = vadd.f32 1.0, %v3213_v19 }
0x1479   :  { %3216 = vrcp.f32 %v1871_v18  ;;  %v1983_v53 = vadd.f32 1.0, %v3215_v14 }
0x147a   :  { %3218 = vrcp.f32 %v1982_v50  ;;  %v44_v50 = vld [vmem:[#allocation2 + $0x78] sm:$0x1] }
0x147b   :  { %3220 = vrcp.f32 %v1983_v53  ;;  %v2419_v53 = vrot.slane %v44_v50, %v3513_v30 }
0x1483   :  { %v3217_v54 = vpop.eup %3216 }
0x1484   :  { %v3219_v42 = vpop.eup %3218  ;;  %v1875_v10 = vmul.f32 %v3217_v54, %v3742_v2 }
0x1485   :  { %v3221_v45 = vpop.eup %3220  ;;  %v1996_v8 = vmul.f32 %v3219_v42, %v1992_v17 }
0x1486   :  { %v1997_v39 = vmul.f32 %v3221_v45, %v1993_v15 }
0x14e4   :  { %v1878_v6 = vpop.permute.xlu1 %1877 }
0x14e5   :  { %v1880_v57 = vmul.f32 %v3217_v54, %v1878_v6 }
0x14e7   :  { %1882 = vrot.lane.b32.xlu0 %v1880_v57, %s3291_s0 }
0x14e8   :  { %v2003_v61 = vpop.permute.xlu0 %2002  ;;  %v2001_v62 = vpop.permute.xlu1 %2000 }
0x14e9   :  { %v2007_v35 = vmul.f32 %v3221_v45, %v2003_v61  ;;  %v2006_v33 = vmul.f32 %v3219_v42, %v2001_v62 }
0x14eb   :  { %2012 = vrot.lane.b32.xlu1 %v2007_v35, %s3291_s0  ;;  %2010 = vrot.lane.b32.xlu0 %v2006_v33, %s3291_s0 }
0x1559   :  { %v1883_v44 = vpop.permute.xlu0 %1882 }
0x155a   :  { %v3790_v37 = vadd.f32 %v1883_v44, %v1875_v10 }
0x155c   :  { %3222 = vtanh.f32 %v3790_v37 }
0x155d   :  { %v2013_v38 = vpop.permute.xlu1 %2012  ;;  %v2011_v40 = vpop.permute.xlu0 %2010 }
0x155e   :  { %v2017_v20 = vadd.f32 %v2013_v38, %v1997_v39  ;;  %v2016_v21 = vadd.f32 %v2011_v40, %v1996_v8 }
0x1560   :  { %3224 = vtanh.f32 %v2017_v20 }
0x1561   :  { %3226 = vtanh.f32 %v2016_v21 }
0x1566   :  { %v3223_v23 = vpop.eup %3222 }
0x1567   :  { %1888 = vrot.lane.b32.xlu1 %v3223_v23, %s3291_s0 }
0x156a   :  { %v3225_v2 = vpop.eup %3224 }
0x156b   :  { %v3227_v41 = vpop.eup %3226  ;;  %2024 = vrot.lane.b32.xlu0 %v3225_v2, %s3291_s0 }
0x156c   :  { %2022 = vrot.lane.b32.xlu1 %v3227_v41, %s3291_s0 }
0x15d9   :  { %v1889_v58 = vpop.permute.xlu1 %1888 }
0x15da   :  { %v1891_v4 = vmul.f32 %v3217_v54, %v1889_v58 }
0x15dc   :  { %v2288_v43 = vrot.slane %v1891_v4, %v3507_v16  ;;  %v2040_v56 = vrot.slane %v1891_v4, 1 }
0x15dd   :  { %v2025_v46 = vpop.permute.xlu0 %2024 }
0x15de   :  { %v2289_v24 = vcombine.high %v2288_v43, %v2288_v43  ;;  %v2296_v25 = vrot.slane %v2288_v43, %v3507_v16  ;;  %v2029_v26 = vmul.f32 %v3221_v45, %v2025_v46  ;;  %v2023_v27 = vpop.permute.xlu1 %2022 }
0x15df   :  { %v2028_v31 = vmul.f32 %v3219_v42, %v2023_v27 }
0x15e0   :  { %v2303_v32 = vrot.slane %v2289_v24, %v3507_v16  ;;  %v2380_v34 = vrot.slane %v2296_v25, %v3513_v30  ;;  %v2032_v9 = vrot.slane %v2029_v26, 7 }
0x15e1   :  { %2033 = vrot.lane.b32.xlu0 %v2028_v31, %s3292_s8 }
0x15e2   :  { %v2384_v36 = vrot.slane %v2303_v32, %v3513_v30  ;;  %2035 = vrot.lane.b32.xlu1 %v2032_v9, %s3292_s8  ;;  %v2411_v5 = vsel %vm2410_vm0, %v3761_v28, %v2380_v34 }
0x15e4   :  { %v2412_v52 = vsel %vm2410_vm0, %v3764_v29, %v2384_v36 }
0x15e5   :  { %2041 = vrot.lane.b32.xlu0 %v2040_v56, %s3293_s2 }
0x1653   :  { %v2034_v49 = vpop.permute.xlu0 %2033 }
0x1654   :  { %v2036_v7 = vpop.permute.xlu1 %2035 }
0x1657   :  { %v2042_v63 = vpop.permute.xlu0 %2041 }
0x1658   :  { %v2044_v1 = vsel %vm144_vm3, %v2034_v49, %v2042_v63  ;;  %v2045_v3 = vsel %vm144_vm3, %v2036_v7, %v2042_v63 }
0x1659   :  { %v2049_v51 = vrot.slane %v2044_v1, 7  ;;  %v2050_v55 = vrot.slane %v2045_v3, 7 }
0x165b   :  { %v2051_v0 = vsel %vm2048_vm8, %v2049_v51, %v2050_v55 }
0x165c   :  { %2885 = vmatmul.mubr.msk.f32.vlgmr.msra.gmra.mrb[14].mxu1 %vm297_vm5, %v2051_v0 }
0x172f   :  { %v2120_v60 = vpop.f32.mrb[14].mxu1 }
0x1730   :  { %v2121_v28 = vadd.f32 %v3727_v12, %v2120_v60  ;;  %v2886_v47 = vpop.f32.mrb[15].mxu1 }
0x1732   :  { %3228 = vtanh.f32 %v2121_v28  ;;  %v2526_v48 = vmul.f32 -1.442695, %v2121_v28 }
0x1734   :  { %3230 = vpow2.f32 %v2526_v48 }
0x173c   :  { %v3229_v29 = vpop.eup %3228 }
0x173d   :  { %2133 = vrot.lane.b32.xlu1 %v3229_v29, %s3291_s0 }
0x173e   :  { %v3231_v11 = vpop.eup %3230 }
0x173f   :  { %v2127_v22 = vadd.f32 1.0, %v3231_v11 }
0x1741   :  { %3232 = vrcp.f32 %v2127_v22 }
0x174b   :  { %v3233_v19 = vpop.eup %3232 }
0x174c   :  { %v2131_v12 = vmul.f32 %v3233_v19, %v3790_v37 }
0x17af   :  { %v2134_v18 = vpop.permute.xlu1 %2133 }
0x17b0   :  { %v2136_v14 = vmul.f32 %v3233_v19, %v2134_v18 }
0x17b2   :  { %2138 = vrot.lane.b32.xlu0 %v2136_v14, %s3291_s0 }
0x17b6   :  { %2421 = vrot.lane.b32.xlu0 %v2419_v53, %s3292_s8 }
0x1824   :  { %v2139_v54 = vpop.permute.xlu0 %2138 }
0x1825   :  { %v2141_v6 = vadd.f32 %v2139_v54, %v2131_v12 }
0x1827   :  { %3234 = vtanh.f32 %v2141_v6 }
0x1828   :  { %v2422_v44 = vpop.permute.xlu0 %2421 }
0x1831   :  { %v3235_v57 = vpop.eup %3234 }
0x1832   :  { %2144 = vrot.lane.b32.xlu1 %v3235_v57, %s3291_s0 }
0x18a4   :  { %v2145_v42 = vpop.permute.xlu1 %2144 }
0x18a5   :  { %v2147_v45 = vmul.f32 %v3233_v19, %v2145_v42 }
0x18a7   :  { %v2311_v61 = vrot.slane %v2147_v45, %v3507_v16 }
0x18a9   :  { %v2312_v62 = vcombine.high %v2311_v61, %v2311_v61  ;;  %v2319_v35 = vrot.slane %v2311_v61, %v3507_v16 }
0x18ab   :  { %v2326_v33 = vrot.slane %v2312_v62, %v3507_v16  ;;  %v2390_v10 = vrot.slane %v2319_v35, %v3513_v30 }
0x18ad   :  { %v2394_v15 = vrot.slane %v2326_v33, %v3513_v30  ;;  %v2414_v17 = vsel %vm2413_vm1, %v2411_v5, %v2390_v10  ;;  %v2451_v30 = vand.u32 127, %v2151_v13 }
0x18ae   :  { %v2424_v37 = vmul.f32 %v2422_v44, %v2414_v17 }
0x18af   :  { %v2415_v39 = vsel %vm2413_vm1, %v2412_v52, %v2394_v15  ;;  %v2454_v41 = vsub.s32 %v2451_v30, %v3504_v59 }
0x18b0   :  { %v2425_v8 = vmul.f32 %v2422_v44, %v2415_v39  ;;  %2428 = vrot.lane.b32.xlu1 %v2424_v37, %s3292_s8 }
0x18b2   :  { %2430 = vrot.lane.b32.xlu0 %v2425_v8, %s3292_s8 }
0x18b4   :  { %2441 = vrot.lane.b32.xlu1 %v44_v50, %s3293_s2 }
0x1922   :  { %v2429_v38 = vpop.permute.xlu1 %2428 }
0x1923   :  { %v2434_v40 = vsel %vm144_vm3, %v2429_v38, 0.0 }
0x1924   :  { %2435 = vadd.xlane.f32.xlu0 %v2434_v40  ;;  %v2431_v16 = vpop.permute.xlu0 %2430 }
0x1925   :  { %v2437_v20 = vsel %vm144_vm3, %v2431_v16, 0.0 }
0x1926   :  { %2438 = vadd.xlane.f32.xlu1 %v2437_v20  ;;  %v2442_v21 = vpop.permute.xlu1 %2441 }
0x1927   :  { %3031 = vpush %v2442_v21 }
0x1958   :  { %s3032_s11 = spop %3031 }
0x1959   :  { %v2444_v23 = vstv %s3032_s11 }
0x19b1   :  { %v2436_v2 = vpop.xlane.xlu0 %2435 }
0x19b2   :  { %v2446_v58 = vadd.f32 %v2444_v23, %v2436_v2 }
0x19b3   :  { %v2439_v4 = vpop.xlane.xlu1 %2438 }
0x19b4   :  { %v2447_v43 = vadd.f32 %v2444_v23, %v2439_v4  ;;  %v2455_v46 = vrot.slane %v2446_v58, %v2454_v41 }
0x19b6   :  { %v2459_v24 = vrot.slane %v2447_v43, %v2454_v41 }
0x19b8   :  { %v2460_v25 = vsel %vm283_vm4, %v2459_v24, %v2455_v46 }
0x19b9   :  { %2463 = vst.msk [vmem:[#allocation5] sm:$0x3] %vm2462_vm2, %v2460_v25 }
0x19ba   :  { %3270 = shalt.err (!%p3267_p12)
}
0x19bb   :  { %s3271_s17 = scalar_lea.hbm %s3845_s3, 32 }
0x19bc   :  { %p3272_p13 = scmp.ne.s32.totalorder %s3845_s3, %s3271_s17  ;;  %p3275_p0 = scmp.lt.u32.totalorder %s3271_s17, %s3845_s3 }
0x19be   :  { %p3277_p1 = pnand %p3275_p0, %p3272_p13 }
0x19c0   :  { %3280 = shalt.err (!%p3277_p1)
}
0x19c1   :  { %2473 = dma.vmem_to_hbm [thread:$0]  %s2471_s13, 32, %s3845_s3, [#allocation4]  }
0x19c2   :  { %3283 = dma.done.wait [#allocation4], 32  }
0x19c3   :  { %3284 = vsyncadd [#allocation4], 4294967264 }
0x19c4   :  { %2477 = vsyncpa [#allocation3], 1 }
0x19c5   :  { %2478 = vsyncpa [#allocation4], 1 }

</bundles_post_ra>
